<compile_context>
chip_gen: v7x
topology: tpu7x:2x2x1
jax: 0.10.0
libtpu: 0.0.40
codegen_flags: <defaults>
</compile_context>

<pallas_src>
import numpy as np
import jax
import jax.numpy as jnp
from jax.experimental import pallas as pl
from jax.experimental.pallas import tpu as pltpu

# ---- static network geometry (small_convnet with ob_space (52, 52, 4)) ------
B = 2
H = W = 52
C_IN = 4
FEAT_DIM = 32
# (kernel, stride, cin, cout, out_spatial) for the three conv layers
CONV_CFG = [(8, 4, 4, 32, 12), (8, 2, 32, 64, 3), (3, 1, 64, 64, 1)]
FLATTEN_DIM = 1 * 1 * 64


# -------------------------------- fused kernel -------------------------------
def _fused_convnet_kernel(lhs1_ref, w1_ref, b1_ref, w2_ref, b2_ref,
                          w3_ref, b3_ref, fcw_ref, fcb_ref, o_ref):
    """Whole forward pass, one invocation, dense weights only.

    lhs1_ref : (288, 256) bf16 conv1 im2col LHS; row r = ow*24 + p*12 + j*2 + b
               corresponds to conv1 output (b, oh=2j+p, ow); cols = (kh,kw,ci).
    wN_ref   : dense bf16 weights reshaped to 2-D (K = (kh,kw,ci), N = cout).
    o_ref    : (B, 32) f32 output.
    """
    f32, bf16 = jnp.float32, jnp.bfloat16

    # ---- conv1: 52x52x4 -(k8,s4)-> 12x12x32 : ONE dot -----------------------
    y1_raw = jnp.dot(lhs1_ref[...], w1_ref[...], preferred_element_type=f32)
    y1_raw = jnp.maximum(y1_raw + b1_ref[...], 0.0)             # (288, 32)

    # relayout (288,32) -> (24,384): rows = (p, j, b) with oh = 2j+p,
    # lanes = (ow, c).  12 aligned 24-row slices + one lane concat.
    y1 = jnp.concatenate(
        [y1_raw[ow * 24:(ow + 1) * 24, :] for ow in range(12)], axis=1)

    # ---- conv2: 12x12x32 -(k8,s2)-> 3x3x64 : ONE dot -------------------------
    # K-concatenated im2col LHS (18, 2048); rows = (ow2, oh2, b), K = (kh,kw,ci)
    kh_blocks = []
    for kh in range(8):
        q, r = divmod(kh, 2)             # input row 2*oh2 + kh = 2*(oh2+q) + r
        rows6 = y1[r * 12 + 2 * q: r * 12 + 2 * q + 6, :]       # (6,384) rows=(oh2,b)
        kh_blocks.append(jnp.concatenate(
            [rows6[:, 64 * ow2: 64 * ow2 + 256] for ow2 in range(3)], axis=0))
    lhs2 = jnp.concatenate(kh_blocks, axis=1).astype(bf16)      # (18, 2048)
    y2_raw = jnp.dot(lhs2, w2_ref[...], preferred_element_type=f32)
    y2_raw = jnp.maximum(y2_raw + b2_ref[...], 0.0)             # (18, 64)

    # ---- conv3: 3x3x64 -(k3,s1)-> 1x1x64 : ONE dot ---------------------------
    # (18,64) rows=(ow2,oh2,b)  ->  (6,192) rows=(oh2,b), lanes=(kw,ci)
    y2 = jnp.concatenate(
        [y2_raw[ow2 * 6:(ow2 + 1) * 6, :] for ow2 in range(3)], axis=1)
    lhs3 = jnp.concatenate(
        [y2[2 * kh: 2 * kh + 2, :] for kh in range(3)],
        axis=1).astype(bf16)                                    # (2, 576), rows=b
    y3 = jnp.dot(lhs3, w3_ref[...], preferred_element_type=f32)
    y3 = jnp.maximum(y3 + b3_ref[...], 0.0)                     # (2, 64)

    # ---- fc + last_nl(ReLU) + layernorm (torch.std unbiased, +1e-8 on std) ---
    z = jnp.dot(y3.astype(bf16), fcw_ref[...], preferred_element_type=f32)
    z = jnp.maximum(z + fcb_ref[...], 0.0)                      # (2, 32)
    mu = jnp.mean(z, axis=-1, keepdims=True)
    d = z - mu
    var = jnp.sum(d * d, axis=-1, keepdims=True) / (z.shape[-1] - 1)
    o_ref[...] = d * pl.reciprocal(jnp.sqrt(var) + 1e-8, approx=False)


# -------------------------------- wrapper ------------------------------------
def _full_spec(shape):
    n = len(shape)
    return pl.BlockSpec(shape, lambda i, _n=n: (0,) * _n)


@jax.jit
def small_convnet_forward(x_nchw, w1, b1, w2, b2, w3, b3, fcw, fcb):
    """x_nchw: (B, C, H, W) like PyTorch.  Returns (B, FEAT_DIM) f32."""
    assert x_nchw.shape == (B, C_IN, H, W)

    # One-time XLA-side im2col for conv1 (k=8, s=4 -> 12x12 output positions).
    x = jnp.transpose(x_nchw, (0, 2, 3, 1)).astype(jnp.float32)   # NHWC (B,52,52,4)
    rsel = 4 * np.arange(12)[:, None] + np.arange(8)[None, :]     # (12 oh, 8 kh)
    csel = 4 * np.arange(12)[:, None] + np.arange(8)[None, :]     # (12 ow, 8 kw)
    p = x[:, rsel]                        # (B, 12oh, 8kh, 52, 4)
    p = p[:, :, :, csel]                  # (B, 12oh, 8kh, 12ow, 8kw, 4ci)
    p = p.reshape(B, 6, 2, 8, 12, 8, C_IN)          # oh -> (j, parity): oh = 2j+p
    p = jnp.transpose(p, (4, 2, 1, 0, 3, 5, 6))     # (ow, parity, j, b, kh, kw, ci)
    lhs1 = p.reshape(12 * 2 * 6 * B, 8 * 8 * C_IN).astype(jnp.bfloat16)  # (288,256)
    # TODO(synk): bf16 LHS is fine for unit-normal test inputs; normalize real
    # 0-255 pixel observations before this cast to avoid bf16 precision loss.

    args = (lhs1, w1, b1, w2, b2, w3, b3, fcw, fcb)
    in_bytes = sum(int(np.prod(a.shape)) * a.dtype.itemsize for a in args)
    out_bytes = B * FEAT_DIM * 4
    return pl.pallas_call(
        _fused_convnet_kernel,
        out_shape=jax.ShapeDtypeStruct((B, FEAT_DIM), jnp.float32),
        grid=(1,),
        in_specs=[_full_spec(a.shape) for a in args],
        out_specs=_full_spec((B, FEAT_DIM)),
        compiler_params=pltpu.CompilerParams(
            dimension_semantics=("arbitrary",)),
        cost_estimate=pl.CostEstimate(
            flops=9_592_832, transcendentals=8,
            bytes_accessed=in_bytes + out_bytes),
    )(*args)


# --------------------------- parameters / weight prep ------------------------
def xavier_uniform(key, shape, fan_in, fan_out):
    bound = float(np.sqrt(6.0 / (fan_in + fan_out)))
    return jax.random.uniform(key, shape, jnp.float32, -bound, bound)


def init_params(key):
    conv_ws, conv_bs = [], []
    for (k, s, ci, co, _oh) in CONV_CFG:
        key, sub = jax.random.split(key)
        conv_ws.append(xavier_uniform(sub, (k, k, ci, co), ci * k * k, co * k * k))
        conv_bs.append(jnp.zeros((co,), jnp.float32))   # torch: constant_(0.)
    key, sub = jax.random.split(key)
    fc_w = xavier_uniform(sub, (FLATTEN_DIM, FEAT_DIM), FLATTEN_DIM, FEAT_DIM)
    fc_b = jnp.zeros((FEAT_DIM,), jnp.float32)
    return conv_ws, conv_bs, fc_w, fc_b


def prep_kernel_params(conv_ws, conv_bs, fc_w, fc_b):
    """Dense bf16 2-D weights only (K ordered (kh, kw, ci)); f32 biases."""
    w1 = conv_ws[0].reshape(8 * 8 * C_IN, 32).astype(jnp.bfloat16)   # (256, 32)
    w2 = conv_ws[1].reshape(8 * 8 * 32, 64).astype(jnp.bfloat16)     # (2048, 64)
    w3 = conv_ws[2].reshape(3 * 3 * 64, 64).astype(jnp.bfloat16)     # (576, 64)
    b1 = conv_bs[0].reshape(1, -1)                                   # (1, 32)
    b2 = conv_bs[1].reshape(1, -1)                                   # (1, 64)
    b3 = conv_bs[2].reshape(1, -1)                                   # (1, 64)
    return (w1, b1, w2, b2, w3, b3,
            fc_w.astype(jnp.bfloat16), fc_b.reshape(1, -1))


# ---------------------------- plain-JAX reference ----------------------------
def ref_forward(x_nchw, conv_ws, conv_bs, fc_w, fc_b):
    x = jnp.transpose(x_nchw, (0, 2, 3, 1)).astype(jnp.float32)
    for (k, s, ci, co, _oh), w, bias in zip(CONV_CFG, conv_ws, conv_bs):
        x = jax.lax.conv_general_dilated(
            x, w, window_strides=(s, s), padding="VALID",
            dimension_numbers=("NHWC", "HWIO", "NHWC"))
        x = jnp.maximum(x + bias, 0.0)
    x = x.reshape(x.shape[0], -1)        # oH = oW = 1 -> same as NCHW flatten
    z = jnp.maximum(x @ fc_w + fc_b, 0.0)
    mu = jnp.mean(z, axis=-1, keepdims=True)
    sd = jnp.std(z, axis=-1, keepdims=True, ddof=1)     # torch.std (unbiased)
    return (z - mu) / (sd + 1e-8)


# ------------------------------------ main ------------------------------------
if __name__ == "__main__":
    key = jax.random.PRNGKey(0)
    key, xk, pk = jax.random.split(key, 3)
    x = jax.random.normal(xk, (B, C_IN, H, W), jnp.float32)   # NCHW like PyTorch

    conv_ws, conv_bs, fc_w, fc_b = init_params(pk)
    kparams = prep_kernel_params(conv_ws, conv_bs, fc_w, fc_b)

    out = small_convnet_forward(x, *kparams)
    out = jax.block_until_ready(out)
    assert out.shape == (B, FEAT_DIM), out.shape
    assert bool(jnp.all(jnp.isfinite(out)))

    # Cross-check vs f32 XLA reference; kernel uses bf16 MXU operands, hence
    # the loose tolerance.
    ref = ref_forward(x, conv_ws, conv_bs, fc_w, fc_b)
    max_err = float(jnp.max(jnp.abs(out - ref)))
    assert bool(jnp.allclose(out, ref, rtol=0.1, atol=0.1)), max_err

    print("KERNEL_OK")
</pallas_src>

<mosaic_0001>
module attributes {stable_mosaic.version = 11 : i64} {
  func.func @_fused_convnet_kernel(%arg0: i32, %arg1: memref<288x256xbf16, #tpu.memory_space<vmem>>, %arg2: memref<256x32xbf16, #tpu.memory_space<vmem>>, %arg3: memref<1x32xf32, #tpu.memory_space<vmem>>, %arg4: memref<2048x64xbf16, #tpu.memory_space<vmem>>, %arg5: memref<1x64xf32, #tpu.memory_space<vmem>>, %arg6: memref<576x64xbf16, #tpu.memory_space<vmem>>, %arg7: memref<1x64xf32, #tpu.memory_space<vmem>>, %arg8: memref<64x32xbf16, #tpu.memory_space<vmem>>, %arg9: memref<1x32xf32, #tpu.memory_space<vmem>>, %arg10: memref<2x32xf32, #tpu.memory_space<vmem>>) attributes {dimension_semantics = [#tpu.dimension_semantics<arbitrary>], iteration_bounds = array<i64: 1>, scalar_prefetch = 0 : i64, scratch_operands = 0 : i64, tpu.core_type = #tpu.core_type<tc>, window_params = [{pipeline_mode = #tpu.pipeline_mode<synchronous>, transform_indices = @transform_0, window_bounds = array<i64: 288, 256>}, {pipeline_mode = #tpu.pipeline_mode<synchronous>, transform_indices = @transform_1, window_bounds = array<i64: 256, 32>}, {pipeline_mode = #tpu.pipeline_mode<synchronous>, transform_indices = @transform_2, window_bounds = array<i64: 1, 32>}, {pipeline_mode = #tpu.pipeline_mode<synchronous>, transform_indices = @transform_3, window_bounds = array<i64: 2048, 64>}, {pipeline_mode = #tpu.pipeline_mode<synchronous>, transform_indices = @transform_4, window_bounds = array<i64: 1, 64>}, {pipeline_mode = #tpu.pipeline_mode<synchronous>, transform_indices = @transform_5, window_bounds = array<i64: 576, 64>}, {pipeline_mode = #tpu.pipeline_mode<synchronous>, transform_indices = @transform_6, window_bounds = array<i64: 1, 64>}, {pipeline_mode = #tpu.pipeline_mode<synchronous>, transform_indices = @transform_7, window_bounds = array<i64: 64, 32>}, {pipeline_mode = #tpu.pipeline_mode<synchronous>, transform_indices = @transform_8, window_bounds = array<i64: 1, 32>}, {pipeline_mode = #tpu.pipeline_mode<synchronous>, transform_indices = @transform_9, window_bounds = array<i64: 2, 32>}]} {
    %c0 = arith.constant 0 : index
    %c0_0 = arith.constant 0 : index
    %0 = vector.load %arg1[%c0, %c0_0] : memref<288x256xbf16, #tpu.memory_space<vmem>>, vector<288x256xbf16>
    %c0_1 = arith.constant 0 : index
    %c0_2 = arith.constant 0 : index
    %1 = vector.load %arg2[%c0_1, %c0_2] : memref<256x32xbf16, #tpu.memory_space<vmem>>, vector<256x32xbf16>
    %cst = arith.constant dense<0.000000e+00> : vector<288x32xf32>
    %2 = tpu.matmul %0, %1, %cst {dimension_numbers = #tpu.dot_dimension_numbers<[1], [0], [0], [1], [0, 0, 1, 1], [], []>} : vector<288x256xbf16>, vector<256x32xbf16>, vector<288x32xf32> -> vector<288x32xf32>
    %c0_3 = arith.constant 0 : index
    %c0_4 = arith.constant 0 : index
    %3 = vector.load %arg3[%c0_3, %c0_4] : memref<1x32xf32, #tpu.memory_space<vmem>>, vector<1x32xf32>
    %4 = vector.broadcast %3 : vector<1x32xf32> to vector<288x32xf32>
    %5 = arith.addf %2, %4 : vector<288x32xf32>
    %cst_5 = arith.constant 0.000000e+00 : f32
    %6 = vector.broadcast %cst_5 : f32 to vector<288x32xf32>
    %7 = arith.maximumf %5, %6 : vector<288x32xf32>
    %8 = vector.extract_strided_slice %7 {offsets = [0, 0], sizes = [24, 32], strides = [1, 1]} : vector<288x32xf32> to vector<24x32xf32>
    %9 = vector.extract_strided_slice %7 {offsets = [24, 0], sizes = [24, 32], strides = [1, 1]} : vector<288x32xf32> to vector<24x32xf32>
    %10 = vector.extract_strided_slice %7 {offsets = [48, 0], sizes = [24, 32], strides = [1, 1]} : vector<288x32xf32> to vector<24x32xf32>
    %11 = vector.extract_strided_slice %7 {offsets = [72, 0], sizes = [24, 32], strides = [1, 1]} : vector<288x32xf32> to vector<24x32xf32>
    %12 = vector.extract_strided_slice %7 {offsets = [96, 0], sizes = [24, 32], strides = [1, 1]} : vector<288x32xf32> to vector<24x32xf32>
    %13 = vector.extract_strided_slice %7 {offsets = [120, 0], sizes = [24, 32], strides = [1, 1]} : vector<288x32xf32> to vector<24x32xf32>
    %14 = vector.extract_strided_slice %7 {offsets = [144, 0], sizes = [24, 32], strides = [1, 1]} : vector<288x32xf32> to vector<24x32xf32>
    %15 = vector.extract_strided_slice %7 {offsets = [168, 0], sizes = [24, 32], strides = [1, 1]} : vector<288x32xf32> to vector<24x32xf32>
    %16 = vector.extract_strided_slice %7 {offsets = [192, 0], sizes = [24, 32], strides = [1, 1]} : vector<288x32xf32> to vector<24x32xf32>
    %17 = vector.extract_strided_slice %7 {offsets = [216, 0], sizes = [24, 32], strides = [1, 1]} : vector<288x32xf32> to vector<24x32xf32>
    %18 = vector.extract_strided_slice %7 {offsets = [240, 0], sizes = [24, 32], strides = [1, 1]} : vector<288x32xf32> to vector<24x32xf32>
    %19 = vector.extract_strided_slice %7 {offsets = [264, 0], sizes = [24, 32], strides = [1, 1]} : vector<288x32xf32> to vector<24x32xf32>
    %20 = tpu.concatenate %8, %9, %10, %11, %12, %13, %14, %15, %16, %17, %18, %19 in 1 : vector<24x32xf32>, vector<24x32xf32>, vector<24x32xf32>, vector<24x32xf32>, vector<24x32xf32>, vector<24x32xf32>, vector<24x32xf32>, vector<24x32xf32>, vector<24x32xf32>, vector<24x32xf32>, vector<24x32xf32>, vector<24x32xf32> -> vector<24x384xf32>
    %21 = vector.extract_strided_slice %20 {offsets = [0, 0], sizes = [6, 384], strides = [1, 1]} : vector<24x384xf32> to vector<6x384xf32>
    %22 = vector.extract_strided_slice %21 {offsets = [0, 0], sizes = [6, 256], strides = [1, 1]} : vector<6x384xf32> to vector<6x256xf32>
    %23 = vector.extract_strided_slice %21 {offsets = [0, 64], sizes = [6, 256], strides = [1, 1]} : vector<6x384xf32> to vector<6x256xf32>
    %24 = vector.extract_strided_slice %21 {offsets = [0, 128], sizes = [6, 256], strides = [1, 1]} : vector<6x384xf32> to vector<6x256xf32>
    %25 = tpu.concatenate %22, %23, %24 in 0 : vector<6x256xf32>, vector<6x256xf32>, vector<6x256xf32> -> vector<18x256xf32>
    %26 = vector.extract_strided_slice %20 {offsets = [12, 0], sizes = [6, 384], strides = [1, 1]} : vector<24x384xf32> to vector<6x384xf32>
    %27 = vector.extract_strided_slice %26 {offsets = [0, 0], sizes = [6, 256], strides = [1, 1]} : vector<6x384xf32> to vector<6x256xf32>
    %28 = vector.extract_strided_slice %26 {offsets = [0, 64], sizes = [6, 256], strides = [1, 1]} : vector<6x384xf32> to vector<6x256xf32>
    %29 = vector.extract_strided_slice %26 {offsets = [0, 128], sizes = [6, 256], strides = [1, 1]} : vector<6x384xf32> to vector<6x256xf32>
    %30 = tpu.concatenate %27, %28, %29 in 0 : vector<6x256xf32>, vector<6x256xf32>, vector<6x256xf32> -> vector<18x256xf32>
    %31 = vector.extract_strided_slice %20 {offsets = [2, 0], sizes = [6, 384], strides = [1, 1]} : vector<24x384xf32> to vector<6x384xf32>
    %32 = vector.extract_strided_slice %31 {offsets = [0, 0], sizes = [6, 256], strides = [1, 1]} : vector<6x384xf32> to vector<6x256xf32>
    %33 = vector.extract_strided_slice %31 {offsets = [0, 64], sizes = [6, 256], strides = [1, 1]} : vector<6x384xf32> to vector<6x256xf32>
    %34 = vector.extract_strided_slice %31 {offsets = [0, 128], sizes = [6, 256], strides = [1, 1]} : vector<6x384xf32> to vector<6x256xf32>
    %35 = tpu.concatenate %32, %33, %34 in 0 : vector<6x256xf32>, vector<6x256xf32>, vector<6x256xf32> -> vector<18x256xf32>
    %36 = vector.extract_strided_slice %20 {offsets = [14, 0], sizes = [6, 384], strides = [1, 1]} : vector<24x384xf32> to vector<6x384xf32>
    %37 = vector.extract_strided_slice %36 {offsets = [0, 0], sizes = [6, 256], strides = [1, 1]} : vector<6x384xf32> to vector<6x256xf32>
    %38 = vector.extract_strided_slice %36 {offsets = [0, 64], sizes = [6, 256], strides = [1, 1]} : vector<6x384xf32> to vector<6x256xf32>
    %39 = vector.extract_strided_slice %36 {offsets = [0, 128], sizes = [6, 256], strides = [1, 1]} : vector<6x384xf32> to vector<6x256xf32>
    %40 = tpu.concatenate %37, %38, %39 in 0 : vector<6x256xf32>, vector<6x256xf32>, vector<6x256xf32> -> vector<18x256xf32>
    %41 = vector.extract_strided_slice %20 {offsets = [4, 0], sizes = [6, 384], strides = [1, 1]} : vector<24x384xf32> to vector<6x384xf32>
    %42 = vector.extract_strided_slice %41 {offsets = [0, 0], sizes = [6, 256], strides = [1, 1]} : vector<6x384xf32> to vector<6x256xf32>
    %43 = vector.extract_strided_slice %41 {offsets = [0, 64], sizes = [6, 256], strides = [1, 1]} : vector<6x384xf32> to vector<6x256xf32>
    %44 = vector.extract_strided_slice %41 {offsets = [0, 128], sizes = [6, 256], strides = [1, 1]} : vector<6x384xf32> to vector<6x256xf32>
    %45 = tpu.concatenate %42, %43, %44 in 0 : vector<6x256xf32>, vector<6x256xf32>, vector<6x256xf32> -> vector<18x256xf32>
    %46 = vector.extract_strided_slice %20 {offsets = [16, 0], sizes = [6, 384], strides = [1, 1]} : vector<24x384xf32> to vector<6x384xf32>
    %47 = vector.extract_strided_slice %46 {offsets = [0, 0], sizes = [6, 256], strides = [1, 1]} : vector<6x384xf32> to vector<6x256xf32>
    %48 = vector.extract_strided_slice %46 {offsets = [0, 64], sizes = [6, 256], strides = [1, 1]} : vector<6x384xf32> to vector<6x256xf32>
    %49 = vector.extract_strided_slice %46 {offsets = [0, 128], sizes = [6, 256], strides = [1, 1]} : vector<6x384xf32> to vector<6x256xf32>
    %50 = tpu.concatenate %47, %48, %49 in 0 : vector<6x256xf32>, vector<6x256xf32>, vector<6x256xf32> -> vector<18x256xf32>
    %51 = vector.extract_strided_slice %20 {offsets = [6, 0], sizes = [6, 384], strides = [1, 1]} : vector<24x384xf32> to vector<6x384xf32>
    %52 = vector.extract_strided_slice %51 {offsets = [0, 0], sizes = [6, 256], strides = [1, 1]} : vector<6x384xf32> to vector<6x256xf32>
    %53 = vector.extract_strided_slice %51 {offsets = [0, 64], sizes = [6, 256], strides = [1, 1]} : vector<6x384xf32> to vector<6x256xf32>
    %54 = vector.extract_strided_slice %51 {offsets = [0, 128], sizes = [6, 256], strides = [1, 1]} : vector<6x384xf32> to vector<6x256xf32>
    %55 = tpu.concatenate %52, %53, %54 in 0 : vector<6x256xf32>, vector<6x256xf32>, vector<6x256xf32> -> vector<18x256xf32>
    %56 = vector.extract_strided_slice %20 {offsets = [18, 0], sizes = [6, 384], strides = [1, 1]} : vector<24x384xf32> to vector<6x384xf32>
    %57 = vector.extract_strided_slice %56 {offsets = [0, 0], sizes = [6, 256], strides = [1, 1]} : vector<6x384xf32> to vector<6x256xf32>
    %58 = vector.extract_strided_slice %56 {offsets = [0, 64], sizes = [6, 256], strides = [1, 1]} : vector<6x384xf32> to vector<6x256xf32>
    %59 = vector.extract_strided_slice %56 {offsets = [0, 128], sizes = [6, 256], strides = [1, 1]} : vector<6x384xf32> to vector<6x256xf32>
    %60 = tpu.concatenate %57, %58, %59 in 0 : vector<6x256xf32>, vector<6x256xf32>, vector<6x256xf32> -> vector<18x256xf32>
    %61 = tpu.concatenate %25, %30, %35, %40, %45, %50, %55, %60 in 1 : vector<18x256xf32>, vector<18x256xf32>, vector<18x256xf32>, vector<18x256xf32>, vector<18x256xf32>, vector<18x256xf32>, vector<18x256xf32>, vector<18x256xf32> -> vector<18x2048xf32>
    %62 = arith.truncf %61 : vector<18x2048xf32> to vector<18x2048xbf16>
    %c0_6 = arith.constant 0 : index
    %c0_7 = arith.constant 0 : index
    %63 = vector.load %arg4[%c0_6, %c0_7] : memref<2048x64xbf16, #tpu.memory_space<vmem>>, vector<2048x64xbf16>
    %cst_8 = arith.constant dense<0.000000e+00> : vector<18x64xf32>
    %64 = tpu.matmul %62, %63, %cst_8 {dimension_numbers = #tpu.dot_dimension_numbers<[1], [0], [0], [1], [0, 0, 1, 1], [], []>} : vector<18x2048xbf16>, vector<2048x64xbf16>, vector<18x64xf32> -> vector<18x64xf32>
    %c0_9 = arith.constant 0 : index
    %c0_10 = arith.constant 0 : index
    %65 = vector.load %arg5[%c0_9, %c0_10] : memref<1x64xf32, #tpu.memory_space<vmem>>, vector<1x64xf32>
    %66 = vector.broadcast %65 : vector<1x64xf32> to vector<18x64xf32>
    %67 = arith.addf %64, %66 : vector<18x64xf32>
    %cst_11 = arith.constant 0.000000e+00 : f32
    %68 = vector.broadcast %cst_11 : f32 to vector<18x64xf32>
    %69 = arith.maximumf %67, %68 : vector<18x64xf32>
    %70 = vector.extract_strided_slice %69 {offsets = [0, 0], sizes = [6, 64], strides = [1, 1]} : vector<18x64xf32> to vector<6x64xf32>
    %71 = vector.extract_strided_slice %69 {offsets = [6, 0], sizes = [6, 64], strides = [1, 1]} : vector<18x64xf32> to vector<6x64xf32>
    %72 = vector.extract_strided_slice %69 {offsets = [12, 0], sizes = [6, 64], strides = [1, 1]} : vector<18x64xf32> to vector<6x64xf32>
    %73 = tpu.concatenate %70, %71, %72 in 1 : vector<6x64xf32>, vector<6x64xf32>, vector<6x64xf32> -> vector<6x192xf32>
    %74 = vector.extract_strided_slice %73 {offsets = [0, 0], sizes = [2, 192], strides = [1, 1]} : vector<6x192xf32> to vector<2x192xf32>
    %75 = vector.extract_strided_slice %73 {offsets = [2, 0], sizes = [2, 192], strides = [1, 1]} : vector<6x192xf32> to vector<2x192xf32>
    %76 = vector.extract_strided_slice %73 {offsets = [4, 0], sizes = [2, 192], strides = [1, 1]} : vector<6x192xf32> to vector<2x192xf32>
    %77 = tpu.concatenate %74, %75, %76 in 1 : vector<2x192xf32>, vector<2x192xf32>, vector<2x192xf32> -> vector<2x576xf32>
    %78 = arith.truncf %77 : vector<2x576xf32> to vector<2x576xbf16>
    %c0_12 = arith.constant 0 : index
    %c0_13 = arith.constant 0 : index
    %79 = vector.load %arg6[%c0_12, %c0_13] : memref<576x64xbf16, #tpu.memory_space<vmem>>, vector<576x64xbf16>
    %cst_14 = arith.constant dense<0.000000e+00> : vector<2x64xf32>
    %80 = tpu.matmul %78, %79, %cst_14 {dimension_numbers = #tpu.dot_dimension_numbers<[1], [0], [0], [1], [0, 0, 1, 1], [], []>} : vector<2x576xbf16>, vector<576x64xbf16>, vector<2x64xf32> -> vector<2x64xf32>
    %c0_15 = arith.constant 0 : index
    %c0_16 = arith.constant 0 : index
    %81 = vector.load %arg7[%c0_15, %c0_16] : memref<1x64xf32, #tpu.memory_space<vmem>>, vector<1x64xf32>
    %82 = vector.broadcast %81 : vector<1x64xf32> to vector<2x64xf32>
    %83 = arith.addf %80, %82 : vector<2x64xf32>
    %cst_17 = arith.constant 0.000000e+00 : f32
    %84 = vector.broadcast %cst_17 : f32 to vector<2x64xf32>
    %85 = arith.maximumf %83, %84 : vector<2x64xf32>
    %86 = arith.truncf %85 : vector<2x64xf32> to vector<2x64xbf16>
    %c0_18 = arith.constant 0 : index
    %c0_19 = arith.constant 0 : index
    %87 = vector.load %arg8[%c0_18, %c0_19] : memref<64x32xbf16, #tpu.memory_space<vmem>>, vector<64x32xbf16>
    %cst_20 = arith.constant dense<0.000000e+00> : vector<2x32xf32>
    %88 = tpu.matmul %86, %87, %cst_20 {dimension_numbers = #tpu.dot_dimension_numbers<[1], [0], [0], [1], [0, 0, 1, 1], [], []>} : vector<2x64xbf16>, vector<64x32xbf16>, vector<2x32xf32> -> vector<2x32xf32>
    %c0_21 = arith.constant 0 : index
    %c0_22 = arith.constant 0 : index
    %89 = vector.load %arg9[%c0_21, %c0_22] : memref<1x32xf32, #tpu.memory_space<vmem>>, vector<1x32xf32>
    %90 = vector.broadcast %89 : vector<1x32xf32> to vector<2x32xf32>
    %91 = arith.addf %88, %90 : vector<2x32xf32>
    %cst_23 = arith.constant 0.000000e+00 : f32
    %92 = vector.broadcast %cst_23 : f32 to vector<2x32xf32>
    %93 = arith.maximumf %91, %92 : vector<2x32xf32>
    %cst_24 = arith.constant dense<0.000000e+00> : vector<2xf32>
    %94 = vector.multi_reduction <add>, %93, %cst_24 [1] : vector<2x32xf32> to vector<2xf32>
    %95 = vector.shape_cast %94 : vector<2xf32> to vector<2x1xf32>
    %cst_25 = arith.constant 3.200000e+01 : f32
    %96 = vector.broadcast %cst_25 : f32 to vector<2x1xf32>
    %97 = arith.divf %95, %96 : vector<2x1xf32>
    %98 = vector.broadcast %97 : vector<2x1xf32> to vector<2x32xf32>
    %99 = arith.subf %93, %98 : vector<2x32xf32>
    %100 = arith.mulf %99, %99 : vector<2x32xf32>
    %cst_26 = arith.constant dense<0.000000e+00> : vector<2xf32>
    %101 = vector.multi_reduction <add>, %100, %cst_26 [1] : vector<2x32xf32> to vector<2xf32>
    %102 = vector.shape_cast %101 : vector<2xf32> to vector<2x1xf32>
    %cst_27 = arith.constant 3.100000e+01 : f32
    %103 = vector.broadcast %cst_27 : f32 to vector<2x1xf32>
    %104 = arith.divf %102, %103 : vector<2x1xf32>
    %105 = math.sqrt %104 : vector<2x1xf32>
    %cst_28 = arith.constant 9.99999993E-9 : f32
    %106 = vector.broadcast %cst_28 : f32 to vector<2x1xf32>
    %107 = arith.addf %105, %106 : vector<2x1xf32>
    %108 = tpu.reciprocal %107 : vector<2x1xf32> -> vector<2x1xf32>
    %109 = vector.broadcast %108 : vector<2x1xf32> to vector<2x32xf32>
    %110 = arith.mulf %99, %109 : vector<2x32xf32>
    %c0_29 = arith.constant 0 : index
    %c0_30 = arith.constant 0 : index
    %111 = vector.load %arg10[%c0_29, %c0_30] : memref<2x32xf32, #tpu.memory_space<vmem>>, vector<2x32xf32>
    tpu.vector_store %arg10[%c0_29, %c0_30], %110 {strides = array<i32>} : memref<2x32xf32, #tpu.memory_space<vmem>>, vector<2x32xf32>,
    return
  }
  func.func @transform_0(%arg0: i32) -> (i32, i32) {
    %c0_i32 = arith.constant 0 : i32
    %c0_i32_0 = arith.constant 0 : i32
    %c0_i32_1 = arith.constant 0 : i32
    return %c0_i32, %c0_i32_0 : i32, i32
  }
  func.func @transform_1(%arg0: i32) -> (i32, i32) {
    %c0_i32 = arith.constant 0 : i32
    %c0_i32_0 = arith.constant 0 : i32
    %c0_i32_1 = arith.constant 0 : i32
    return %c0_i32, %c0_i32_0 : i32, i32
  }
  func.func @transform_2(%arg0: i32) -> (i32, i32) {
    %c0_i32 = arith.constant 0 : i32
    %c0_i32_0 = arith.constant 0 : i32
    %c0_i32_1 = arith.constant 0 : i32
    return %c0_i32, %c0_i32_0 : i32, i32
  }
  func.func @transform_3(%arg0: i32) -> (i32, i32) {
    %c0_i32 = arith.constant 0 : i32
    %c0_i32_0 = arith.constant 0 : i32
    %c0_i32_1 = arith.constant 0 : i32
    return %c0_i32, %c0_i32_0 : i32, i32
  }
  func.func @transform_4(%arg0: i32) -> (i32, i32) {
    %c0_i32 = arith.constant 0 : i32
    %c0_i32_0 = arith.constant 0 : i32
    %c0_i32_1 = arith.constant 0 : i32
    return %c0_i32, %c0_i32_0 : i32, i32
  }
  func.func @transform_5(%arg0: i32) -> (i32, i32) {
    %c0_i32 = arith.constant 0 : i32
    %c0_i32_0 = arith.constant 0 : i32
    %c0_i32_1 = arith.constant 0 : i32
    return %c0_i32, %c0_i32_0 : i32, i32
  }
  func.func @transform_6(%arg0: i32) -> (i32, i32) {
    %c0_i32 = arith.constant 0 : i32
    %c0_i32_0 = arith.constant 0 : i32
    %c0_i32_1 = arith.constant 0 : i32
    return %c0_i32, %c0_i32_0 : i32, i32
  }
  func.func @transform_7(%arg0: i32) -> (i32, i32) {
    %c0_i32 = arith.constant 0 : i32
    %c0_i32_0 = arith.constant 0 : i32
    %c0_i32_1 = arith.constant 0 : i32
    return %c0_i32, %c0_i32_0 : i32, i32
  }
  func.func @transform_8(%arg0: i32) -> (i32, i32) {
    %c0_i32 = arith.constant 0 : i32
    %c0_i32_0 = arith.constant 0 : i32
    %c0_i32_1 = arith.constant 0 : i32
    return %c0_i32, %c0_i32_0 : i32, i32
  }
  func.func @transform_9(%arg0: i32) -> (i32, i32) {
    %c0_i32 = arith.constant 0 : i32
    %c0_i32_0 = arith.constant 0 : i32
    %c0_i32_1 = arith.constant 0 : i32
    return %c0_i32, %c0_i32_0 : i32, i32
  }
}

</mosaic_0001>

<bundles_post_ra>
// kernel: small_convnet_forward.1
= control target key start
LH: loop header
LB: loop body
LE: loop exit
PB: predicated region body
PF: predicated region fallthrough
CT: control target
= control target key end

     0   :  { %v3917_v1 = vmov 0   ;;  %s5153_s0 = inlined_call_operand.vmem [shape: bf16[288,256], index: 0, kind: input, shape index: {}]   ;;  %s5154_s1 = inlined_call_operand.vmem [shape: bf16[256,32], index: 1, kind: input, shape index: {}]   ;;  %s5155_s2 = inlined_call_operand.vmem [shape: f32[1,32], index: 2, kind: input, shape index: {}]   ;;  %s5156_s3 = inlined_call_operand.vmem [shape: bf16[2048,64], index: 3, kind: input, shape index: {}]   ;;  %s5157_s4 = inlined_call_operand.vmem [shape: f32[1,64], index: 4, kind: input, shape index: {}]   ;;  %s5158_s5 = inlined_call_operand.vmem [shape: bf16[576,64], index: 5, kind: input, shape index: {}]   ;;  %s5159_s6 = inlined_call_operand.vmem [shape: f32[1,64], index: 6, kind: input, shape index: {}]   ;;  %s5160_s7 = inlined_call_operand.vmem [shape: bf16[64,32], index: 7, kind: input, shape index: {}]   ;;  %s5161_s8 = inlined_call_operand.vmem [shape: f32[1,32], index: 8, kind: input, shape index: {}]   ;;  %s5162_s9 = inlined_call_operand.hbm [shape: f32[2,32], index: 9, kind: output, shape index: {}]  }
   0x1   :  { %v3651_v0 = vld [vmem:[%s5154_s1] sm:$0xff]   ;;  %385 = vmatprep.subr.bf16.mxu0 %v3917_v1  ;;  %v3652_v2 = vld [vmem:[%s5154_s1 + $0x8] sm:$0xff]   ;;  %v3653_v3 = vld [vmem:[%s5154_s1 + $0x10] sm:$0xff]  }
   0x2   :  { %386 = vmatpush1.bf16.msra.mxu0 %v3651_v0  ;;  %v3654_v4 = vld [vmem:[%s5154_s1 + $0x18] sm:$0xff]   ;;  %v3655_v5 = vld [vmem:[%s5154_s1 + $0x20] sm:$0xff]   ;;  %v3656_v7 = vld [vmem:[%s5154_s1 + $0x28] sm:$0xff]  }
   0x3   :  { %387 = vmatprep.subr.bf16.mxu0 %v3917_v1  ;;  %v3669_v6 = vld [vmem:[%s5153_s0 + $0x4] ss:$8 sps:$4 sm:$0xff]   ;;  %v3657_v8 = vld [vmem:[%s5154_s1 + $0x30] sm:$0xff]   ;;  %v3658_v9 = vld [vmem:[%s5154_s1 + $0x38] sm:$0xff]  }
   0x4   :  { %417 = vmatprep.mubr.bf16.mxu0 %v3669_v6  ;;  %v3659_v10 = vld [vmem:[%s5154_s1 + $0x40] sm:$0xff]   ;;  %v3660_v11 = vld [vmem:[%s5154_s1 + $0x48] sm:$0xff]   ;;  %v3661_v12 = vld [vmem:[%s5154_s1 + $0x50] sm:$0xff]  }
   0x5   :  { %v3662_v13 = vld [vmem:[%s5154_s1 + $0x58] sm:$0xff]   ;;  %v3663_v14 = vld [vmem:[%s5154_s1 + $0x60] sm:$0xff]   ;;  %v3664_v15 = vld [vmem:[%s5154_s1 + $0x68] sm:$0xff]  }
   0x6   :  { %388 = vmatpush1.bf16.msra.mxu0 %v3652_v2  ;;  %v3665_v16 = vld [vmem:[%s5154_s1 + $0x70] sm:$0xff]   ;;  %v3666_v17 = vld [vmem:[%s5154_s1 + $0x78] sm:$0xff]   ;;  %v3667_v18 = vld [vmem:[%s5153_s0] ss:$8 sps:$4 sm:$0xff]  }
   0x7   :  { %389 = vmatprep.subr.bf16.mxu0 %v3917_v1  ;;  %v3670_v19 = vld [vmem:[%s5153_s0 + $0x14] ss:$8 sps:$4 sm:$0xff]   ;;  %v3672_v20 = vld [vmem:[%s5153_s0 + $0x10] ss:$8 sps:$4 sm:$0xff]   ;;  %v3673_v21 = vld [vmem:[%s5153_s0 + $0x24] ss:$8 sps:$4 sm:$0xff]  }
   0x8   :  { %v3675_v22 = vld [vmem:[%s5153_s0 + $0x20] ss:$8 sps:$4 sm:$0xff]   ;;  %v3676_v23 = vld [vmem:[%s5153_s0 + $0x34] ss:$8 sps:$4 sm:$0xff]   ;;  %v3678_v24 = vld [vmem:[%s5153_s0 + $0x30] ss:$8 sps:$4 sm:$0xff]  }
   0x9   :  { %v3679_v25 = vld [vmem:[%s5153_s0 + $0x44] ss:$8 sps:$4 sm:$0xff]   ;;  %v3681_v26 = vld [vmem:[%s5153_s0 + $0x40] ss:$8 sps:$4 sm:$0xff]   ;;  %v3682_v27 = vld [vmem:[%s5153_s0 + $0x54] ss:$8 sps:$4 sm:$0xff]  }
   0xa   :  { %390 = vmatpush1.bf16.msra.mxu0 %v3653_v3  ;;  %v3684_v28 = vld [vmem:[%s5153_s0 + $0x50] ss:$8 sps:$4 sm:$0xff]   ;;  %v3685_v29 = vld [vmem:[%s5153_s0 + $0x64] ss:$8 sps:$4 sm:$0xff]   ;;  %v3687_v30 = vld [vmem:[%s5153_s0 + $0x60] ss:$8 sps:$4 sm:$0xff]  }
   0xb   :  { %391 = vmatprep.subr.bf16.mxu0 %v3917_v1  ;;  %v3688_v31 = vld [vmem:[%s5153_s0 + $0x74] ss:$8 sps:$4 sm:$0xff]   ;;  %v3690_v32 = vld [vmem:[%s5153_s0 + $0x70] ss:$8 sps:$4 sm:$0xff]   ;;  %v3691_v33 = vld [vmem:[%s5153_s0 + $0x84] ss:$8 sps:$4 sm:$0xff]  }
   0xc   :  { %v3693_v34 = vld [vmem:[%s5153_s0 + $0x80] ss:$8 sps:$4 sm:$0xff]   ;;  %v3694_v35 = vld [vmem:[%s5153_s0 + $0x94] ss:$8 sps:$4 sm:$0xff]   ;;  %v3696_v36 = vld [vmem:[%s5153_s0 + $0x90] ss:$8 sps:$4 sm:$0xff]  }
   0xd   :  { %v3697_v37 = vld [vmem:[%s5153_s0 + $0xa4] ss:$8 sps:$4 sm:$0xff]   ;;  %v3699_v38 = vld [vmem:[%s5153_s0 + $0xa0] ss:$8 sps:$4 sm:$0xff]   ;;  %v3700_v39 = vld [vmem:[%s5153_s0 + $0xb4] ss:$8 sps:$4 sm:$0xff]  }
   0xe   :  { %392 = vmatpush1.bf16.msra.mxu0 %v3654_v4  ;;  %v3702_v40 = vld [vmem:[%s5153_s0 + $0xb0] ss:$8 sps:$4 sm:$0xff]   ;;  %v3703_v41 = vld [vmem:[%s5153_s0 + $0xc4] ss:$8 sps:$4 sm:$0xff]  }
   0xf   :  { %393 = vmatprep.subr.bf16.mxu0 %v3917_v1 }
  0x12   :  { %394 = vmatpush1.bf16.msra.mxu0 %v3655_v5 }
  0x13   :  { %395 = vmatprep.subr.bf16.mxu0 %v3917_v1 }
  0x16   :  { %396 = vmatpush1.bf16.msra.mxu0 %v3656_v7 }
  0x17   :  { %397 = vmatprep.subr.bf16.mxu0 %v3917_v1 }
  0x1a   :  { %398 = vmatpush1.bf16.msra.mxu0 %v3657_v8 }
  0x1b   :  { %399 = vmatprep.subr.bf16.mxu0 %v3917_v1 }
  0x1e   :  { %400 = vmatpush1.bf16.msra.mxu0 %v3658_v9 }
  0x1f   :  { %401 = vmatprep.subr.bf16.mxu0 %v3917_v1 }
  0x22   :  { %402 = vmatpush1.bf16.msra.mxu0 %v3659_v10 }
  0x23   :  { %403 = vmatprep.subr.bf16.mxu0 %v3917_v1 }
  0x26   :  { %404 = vmatpush1.bf16.msra.mxu0 %v3660_v11 }
  0x27   :  { %405 = vmatprep.subr.bf16.mxu0 %v3917_v1 }
  0x2a   :  { %406 = vmatpush1.bf16.msra.mxu0 %v3661_v12 }
  0x2b   :  { %407 = vmatprep.subr.bf16.mxu0 %v3917_v1 }
  0x2e   :  { %408 = vmatpush1.bf16.msra.mxu0 %v3662_v13 }
  0x2f   :  { %409 = vmatprep.subr.bf16.mxu0 %v3917_v1 }
  0x32   :  { %410 = vmatpush1.bf16.msra.mxu0 %v3663_v14 }
  0x33   :  { %411 = vmatprep.subr.bf16.mxu0 %v3917_v1 }
  0x36   :  { %412 = vmatpush1.bf16.msra.mxu0 %v3664_v15 }
  0x37   :  { %413 = vmatprep.subr.bf16.mxu0 %v3917_v1 }
  0x3a   :  { %414 = vmatpush1.bf16.msra.mxu0 %v3665_v16 }
  0x3b   :  { %415 = vmatprep.subr.bf16.mxu0 %v3917_v1 }
  0x3e   :  { %416 = vmatpush1.bf16.msra.mxu0 %v3666_v17 }
  0x41   :  { %418 = vmatmul.mubr.bf16.vlgmr.msra.gmra.mrb[0].mxu0 %v3667_v18 }
  0x42   :  { %425 = vmatprep.mubr.bf16.mxu0 %v3670_v19 }
  0x49   :  { %426 = vmatmul.mubr.bf16.gmra.mrb[4].mxu0 %v3672_v20 }
  0x4a   :  { %433 = vmatprep.mubr.bf16.mxu0 %v3673_v21 }
  0x51   :  { %434 = vmatmul.mubr.bf16.gmra.mrb[8].mxu0 %v3675_v22 }
  0x52   :  { %441 = vmatprep.mubr.bf16.mxu0 %v3676_v23 }
  0x59   :  { %442 = vmatmul.mubr.bf16.gmra.mrb[12].mxu0 %v3678_v24 }
  0x5a   :  { %449 = vmatprep.mubr.bf16.mxu0 %v3679_v25 }
  0x61   :  { %450 = vmatmul.mubr.bf16.gmra.mrb[16].mxu0 %v3681_v26 }
  0x62   :  { %457 = vmatprep.mubr.bf16.mxu0 %v3682_v27 }
  0x69   :  { %458 = vmatmul.mubr.bf16.gmra.mrb[20].mxu0 %v3684_v28 }
  0x6a   :  { %465 = vmatprep.mubr.bf16.mxu0 %v3685_v29 }
  0x71   :  { %466 = vmatmul.mubr.bf16.gmra.mrb[24].mxu0 %v3687_v30 }
  0x72   :  { %473 = vmatprep.mubr.bf16.mxu0 %v3688_v31 }
  0x79   :  { %474 = vmatmul.mubr.bf16.gmra.mrb[28].mxu0 %v3690_v32 }
  0x7a   :  { %481 = vmatprep.mubr.bf16.mxu0 %v3691_v33 }
  0x81   :  { %482 = vmatmul.mubr.bf16.gmra.mrb[32].mxu0 %v3693_v34 }
  0x82   :  { %489 = vmatprep.mubr.bf16.mxu0 %v3694_v35 }
  0x89   :  { %490 = vmatmul.mubr.bf16.gmra.mrb[36].mxu0 %v3696_v36 }
  0x8a   :  { %497 = vmatprep.mubr.bf16.mxu0 %v3697_v37 }
  0x91   :  { %498 = vmatmul.mubr.bf16.gmra.mrb[40].mxu0 %v3699_v38 }
  0x92   :  { %505 = vmatprep.mubr.bf16.mxu0 %v3700_v39 }
  0x93   :  { %14 = vsyncpa [#allocation3], 0  ;;  %v3705_v42 = vld [vmem:[%s5153_s0 + $0xc0] ss:$8 sps:$4 sm:$0xff]   ;;  %v3706_v43 = vld [vmem:[%s5153_s0 + $0xd4] ss:$8 sps:$4 sm:$0xff]  }
  0x94   :  { %v3708_v44 = vld [vmem:[%s5153_s0 + $0xd0] ss:$8 sps:$4 sm:$0xff]   ;;  %v3709_v45 = vld [vmem:[%s5153_s0 + $0xe4] ss:$8 sps:$4 sm:$0xff]   ;;  %v3711_v46 = vld [vmem:[%s5153_s0 + $0xe0] ss:$8 sps:$4 sm:$0xff]  }
  0x95   :  { %v3712_v47 = vld [vmem:[%s5153_s0 + $0xf4] ss:$8 sps:$4 sm:$0xff]   ;;  %v3714_v48 = vld [vmem:[%s5153_s0 + $0xf0] ss:$8 sps:$4 sm:$0xff]   ;;  %v3715_v49 = vld [vmem:[%s5153_s0 + $0x104] ss:$8 sps:$4 sm:$0xff]  }
  0x96   :  { %v3717_v50 = vld [vmem:[%s5153_s0 + $0x100] ss:$8 sps:$4 sm:$0xff]   ;;  %v3718_v51 = vld [vmem:[%s5153_s0 + $0x114] ss:$8 sps:$4 sm:$0xff]   ;;  %v3720_v52 = vld [vmem:[%s5153_s0 + $0x110] ss:$8 sps:$4 sm:$0xff]  }
  0x97   :  { %v4143_v1 = vld [vmem:[%s5155_s2] ss:$0 sm:$0xff]  ;;  %s3918_s27 = smov 64   ;;  %s3919_s2 = smov 32   ;;  %vm706_vm0 = vcmask 261120   ;;  %vm710_vm1 = vcmask 523264  }
  0x98   :  { %s3920_s28 = smov 96   ;;  %vm714_vm2 = vcmask 785408   ;;  %vm776_vm3 = vcmask 1041408   ;;  %vm759_vm4 = vcmask 1043456   ;;  %vm756_vm5 = vcmask 1045504  }
  0x99   :  { %506 = vmatmul.mubr.bf16.gmra.mrb[44].mxu0 %v3702_v40  ;;  %vm3922_vm6 = vmmov 0   ;;  %vm2943_vm7 = vcmask 254976  }
  0x9a   :  { %513 = vmatprep.mubr.bf16.mxu0 %v3703_v41 }
  0xa1   :  { %514 = vmatmul.mubr.bf16.gmra.mrb[48].mxu0 %v3705_v42 }
  0xa2   :  { %521 = vmatprep.mubr.bf16.mxu0 %v3706_v43 }
  0xa9   :  { %522 = vmatmul.mubr.bf16.gmra.mrb[52].mxu0 %v3708_v44 }
  0xaa   :  { %529 = vmatprep.mubr.bf16.mxu0 %v3709_v45 }
  0xb1   :  { %530 = vmatmul.mubr.bf16.gmra.mrb[56].mxu0 %v3711_v46 }
  0xb2   :  { %537 = vmatprep.mubr.bf16.mxu0 %v3712_v47 }
  0xb9   :  { %538 = vmatmul.mubr.bf16.gmra.mrb[60].mxu0 %v3714_v48 }
  0xba   :  { %545 = vmatprep.mubr.bf16.mxu0 %v3715_v49 }
  0xc1   :  { %546 = vmatmul.mubr.bf16.gmra.mrb[64].mxu0 %v3717_v50 }
  0xc2   :  { %553 = vmatprep.mubr.bf16.mxu0 %v3718_v51 }
  0xc9   :  { %554 = vmatmul.mubr.bf16.gmra.mrb[68].mxu0 %v3720_v52 }
 0x114   :  { %v4130_v53 = vpop.f32.mrb[0].mxu0 }
 0x115   :  { %v421_v54 = vpop.f32.mrb[1].mxu0 }
 0x116   :  { %v4132_v55 = vpop.f32.mrb[2].mxu0 }
 0x117   :  { %v424_v56 = vpop.f32.mrb[3].mxu0 }
 0x11c   :  { %v4134_v57 = vpop.f32.mrb[4].mxu0 }
 0x11d   :  { %v429_v58 = vpop.f32.mrb[5].mxu0 }
 0x11e   :  { %v430_v59 = vpop.f32.mrb[6].mxu0 }
 0x11f   :  { %v432_v60 = vpop.f32.mrb[7].mxu0  ;;  %v431_v34 = vadd.f32 %v4143_v1, %v430_v59 }
 0x121   :  { %v565_v39 = vmax.f32 %v431_v34, 0.0 }
 0x124   :  { %v4136_v61 = vpop.f32.mrb[8].mxu0 }
 0x125   :  { %v437_v62 = vpop.f32.mrb[9].mxu0 }
 0x126   :  { %v4138_v63 = vpop.f32.mrb[10].mxu0 }
 0x127   :  { %v440_v0 = vpop.f32.mrb[11].mxu0 }
 0x12c   :  { %v443_v2 = vpop.f32.mrb[12].mxu0 }
 0x12d   :  { %v444_v3 = vadd.f32 %v4143_v1, %v443_v2  ;;  %v445_v4 = vpop.f32.mrb[13].mxu0 }
 0x12e   :  { %v446_v5 = vpop.f32.mrb[14].mxu0 }
 0x12f   :  { %v568_v6 = vmax.f32 %v444_v3, 0.0  ;;  %v448_v7 = vpop.f32.mrb[15].mxu0  ;;  %v447_v8 = vadd.f32 %v4143_v1, %v446_v5 }
 0x131   :  { %613 = vrot.lane.b32.xlu1 %v568_v6, %s3918_s27  ;;  %v569_v13 = vmax.f32 %v447_v8, 0.0 }
 0x134   :  { %v451_v9 = vpop.f32.mrb[16].mxu0 }
 0x135   :  { %v452_v10 = vadd.f32 %v4143_v1, %v451_v9  ;;  %v453_v11 = vpop.f32.mrb[17].mxu0 }
 0x136   :  { %v4149_v12 = vpop.f32.mrb[18].mxu0 }
 0x137   :  { %v570_v14 = vmax.f32 %v452_v10, 0.0  ;;  %v456_v15 = vpop.f32.mrb[19].mxu0 }
 0x139   :  { %v4151_v16 = vpack.i.bf16 %v570_v14, %v569_v13 }
 0x13c   :  { %v459_v17 = vpop.f32.mrb[20].mxu0 }
 0x13d   :  { %v460_v18 = vadd.f32 %v4143_v1, %v459_v17  ;;  %v461_v19 = vpop.f32.mrb[21].mxu0 }
 0x13e   :  { %v462_v20 = vpop.f32.mrb[22].mxu0 }
 0x13f   :  { %v463_v21 = vadd.f32 %v4143_v1, %v462_v20  ;;  %v464_v22 = vpop.f32.mrb[23].mxu0  ;;  %v572_v23 = vmax.f32 %v460_v18, 0.0 }
 0x141   :  { %v573_v24 = vmax.f32 %v463_v21, 0.0 }
 0x143   :  { %v4155_v25 = vpack.i.bf16 %v573_v24, %v572_v23  ;;  %v436_v24 = vadd.f32 %v4143_v1, %v4136_v61 }
 0x144   :  { %v4157_v26 = vpop.f32.mrb[24].mxu0 }
 0x145   :  { %v469_v27 = vpop.f32.mrb[25].mxu0 }
 0x146   :  { %v4159_v28 = vpop.f32.mrb[26].mxu0 }
 0x147   :  { %v472_v29 = vpop.f32.mrb[27].mxu0 }
 0x14c   :  { %v4161_v30 = vpop.f32.mrb[28].mxu0 }
 0x14d   :  { %v477_v31 = vpop.f32.mrb[29].mxu0 }
 0x14e   :  { %v478_v32 = vpop.f32.mrb[30].mxu0 }
 0x14f   :  { %v480_v33 = vpop.f32.mrb[31].mxu0  ;;  %v479_v13 = vadd.f32 %v4143_v1, %v478_v32 }
 0x151   :  { %v577_v19 = vmax.f32 %v479_v13, 0.0 }
 0x154   :  { %v483_v35 = vpop.f32.mrb[32].mxu0 }
 0x155   :  { %v484_v36 = vadd.f32 %v4143_v1, %v483_v35  ;;  %v485_v37 = vpop.f32.mrb[33].mxu0 }
 0x156   :  { %v486_v38 = vpop.f32.mrb[34].mxu0 }
 0x157   :  { %v578_v40 = vmax.f32 %v484_v36, 0.0  ;;  %v488_v41 = vpop.f32.mrb[35].mxu0  ;;  %v487_v21 = vadd.f32 %v4143_v1, %v486_v38  ;;  %v566_v36 = vmax.f32 %v436_v24, 0.0  ;;  %v3727_v24 = vld [vmem:[%s5156_s3 + $0x58] sm:$0xff]  }
 0x159   :  { %v3516_v42 = vpack.i.bf16 %v578_v40, %v565_v39  ;;  %v579_v32 = vmax.f32 %v487_v21, 0.0 }
 0x15b   :  { %3517 = vrot.lane.b32.xlu0 %v3516_v42, %s3919_s2 }
 0x15c   :  { %v491_v43 = vpop.f32.mrb[36].mxu0 }
 0x15d   :  { %v493_v44 = vpop.f32.mrb[37].mxu0  ;;  %v492_v38 = vadd.f32 %v4143_v1, %v491_v43 }
 0x15e   :  { %v494_v45 = vpop.f32.mrb[38].mxu0 }
 0x15f   :  { %v496_v46 = vpop.f32.mrb[39].mxu0  ;;  %v495_v47 = vadd.f32 %v4143_v1, %v494_v45  ;;  %v580_v45 = vmax.f32 %v492_v38, 0.0 }
 0x161   :  { %v581_v52 = vmax.f32 %v495_v47, 0.0 }
 0x164   :  { %v499_v48 = vpop.f32.mrb[40].mxu0 }
 0x165   :  { %v500_v49 = vadd.f32 %v4143_v1, %v499_v48  ;;  %v501_v50 = vpop.f32.mrb[41].mxu0  ;;  %v455_v48 = vadd.f32 %v4143_v1, %v4149_v12 }
 0x166   :  { %v502_v51 = vpop.f32.mrb[42].mxu0 }
 0x167   :  { %v582_v54 = vmax.f32 %v500_v49, 0.0  ;;  %v504_v56 = vpop.f32.mrb[43].mxu0  ;;  %v503_v43 = vadd.f32 %v4143_v1, %v502_v51 }
 0x169   :  { %v4168_v58 = vpack.i.bf16 %v582_v54, %v581_v52  ;;  %v571_v54 = vmax.f32 %v455_v48, 0.0  ;;  %v583_v12 = vmax.f32 %v503_v43, 0.0 }
 0x16c   :  { %v507_v59 = vpop.f32.mrb[44].mxu0 }
 0x16d   :  { %v508_v60 = vadd.f32 %v4143_v1, %v507_v59  ;;  %v509_v62 = vpop.f32.mrb[45].mxu0 }
 0x16e   :  { %v510_v0 = vpop.f32.mrb[46].mxu0 }
 0x16f   :  { %v511_v2 = vadd.f32 %v4143_v1, %v510_v0  ;;  %v512_v3 = vpop.f32.mrb[47].mxu0  ;;  %v584_v4 = vmax.f32 %v508_v60, 0.0 }
 0x171   :  { %v585_v5 = vmax.f32 %v511_v2, 0.0 }
 0x173   :  { %v4172_v6 = vpack.i.bf16 %v585_v5, %v584_v4 }
 0x174   :  { %v4174_v7 = vpop.f32.mrb[48].mxu0 }
 0x175   :  { %v517_v8 = vpop.f32.mrb[49].mxu0 }
 0x176   :  { %v4176_v9 = vpop.f32.mrb[50].mxu0 }
 0x177   :  { %v520_v10 = vpop.f32.mrb[51].mxu0 }
 0x17c   :  { %v4178_v11 = vpop.f32.mrb[52].mxu0 }
 0x17d   :  { %v525_v14 = vpop.f32.mrb[53].mxu0 }
 0x17e   :  { %v526_v15 = vpop.f32.mrb[54].mxu0 }
 0x17f   :  { %v527_v17 = vadd.f32 %v4143_v1, %v526_v15  ;;  %v528_v18 = vpop.f32.mrb[55].mxu0  ;;  %v439_v15 = vadd.f32 %v4143_v1, %v4138_v63  ;;  %v3721_v63 = vld [vmem:[%s5156_s3 + $0x40] sm:$0xff]  }
 0x180   :  { %3207 = vmatprep.subr.bf16.mxu1 %v3721_v63  ;;  %v476_v63 = vadd.f32 %v4143_v1, %v4161_v30 }
 0x181   :  { %v589_v20 = vmax.f32 %v527_v17, 0.0  ;;  %v567_v21 = vmax.f32 %v439_v15, 0.0 }
 0x182   :  { %v576_v30 = vmax.f32 %v476_v63, 0.0 }
 0x183   :  { %v3521_v22 = vpack.i.bf16 %v589_v20, %v577_v19 }
 0x184   :  { %v531_v23 = vpop.f32.mrb[56].mxu0 }
 0x185   :  { %v532_v27 = vadd.f32 %v4143_v1, %v531_v23  ;;  %v533_v29 = vpop.f32.mrb[57].mxu0  ;;  %3522 = vrot.lane.b32.xlu0 %v3521_v22, %s3919_s2  ;;  %v3726_v23 = vld [vmem:[%s5156_s3 + $0x10] sm:$0xff]  }
 0x186   :  { %v534_v31 = vpop.f32.mrb[58].mxu0 }
 0x187   :  { %v590_v33 = vmax.f32 %v532_v27, 0.0  ;;  %v535_v34 = vadd.f32 %v4143_v1, %v534_v31  ;;  %v536_v35 = vpop.f32.mrb[59].mxu0  ;;  %v3728_v27 = vld [vmem:[%s5156_s3 + $0x18] sm:$0xff]   ;;  %v3729_v31 = vld [vmem:[%s5156_s3 + $0x60] sm:$0xff]  }
 0x189   :  { %v3536_v37 = vpack.i.bf16 %v590_v33, %v579_v32  ;;  %v591_v39 = vmax.f32 %v535_v34, 0.0  ;;  %v3730_v32 = vld [vmem:[%s5156_s3 + $0x20] sm:$0xff]   ;;  %v3731_v33 = vld [vmem:[%s5156_s3 + $0x68] sm:$0xff]   ;;  %v420_v34 = vadd.f32 %v4143_v1, %v4130_v53 }
 0x18b   :  { %v3541_v40 = vpack.i.bf16 %v566_v36, %v591_v39  ;;  %v3733_v39 = vld [vmem:[%s5156_s3 + $0x70] sm:$0xff]   ;;  %v562_v38 = vmax.f32 %v420_v34, 0.0 }
 0x18c   :  { %v539_v41 = vpop.f32.mrb[60].mxu0 }
 0x18d   :  { %v540_v61 = vadd.f32 %v4143_v1, %v539_v41  ;;  %v541_v42 = vpop.f32.mrb[61].mxu0  ;;  %v3734_v41 = vld [vmem:[%s5156_s3 + $0x30] sm:$0xff]  }
 0x18e   :  { %v542_v44 = vpop.f32.mrb[62].mxu0 }
 0x18f   :  { %v592_v46 = vmax.f32 %v540_v61, 0.0  ;;  %v544_v47 = vpop.f32.mrb[63].mxu0  ;;  %v543_v50 = vadd.f32 %v4143_v1, %v542_v44 }
 0x191   :  { %v3526_v49 = vpack.i.bf16 %v592_v46, %v580_v45  ;;  %v593_v62 = vmax.f32 %v543_v50, 0.0  ;;  %v468_v45 = vadd.f32 %v4143_v1, %v4157_v26  ;;  %v516_v46 = vadd.f32 %v4143_v1, %v4174_v7 }
 0x193   :  { %3527 = vrot.lane.b32.xlu1 %v3526_v49, %s3918_s27  ;;  %v574_v7 = vmax.f32 %v468_v45, 0.0 }
 0x194   :  { %v547_v52 = vpop.f32.mrb[64].mxu0 }
 0x195   :  { %v548_v56 = vadd.f32 %v4143_v1, %v547_v52  ;;  %v549_v59 = vpop.f32.mrb[65].mxu0  ;;  %v3735_v52 = vld [vmem:[%s5156_s3 + $0x78] sm:$0xff]  }
 0x196   :  { %v550_v60 = vpop.f32.mrb[66].mxu0  ;;  %v586_v59 = vmax.f32 %v516_v46, 0.0 }
 0x197   :  { %v594_v0 = vmax.f32 %v548_v56, 0.0  ;;  %v551_v2 = vadd.f32 %v4143_v1, %v550_v60  ;;  %v552_v3 = vpop.f32.mrb[67].mxu0  ;;  %625 = vrot.lane.b32.xlu1 %v571_v54, %s3920_s28  ;;  %v3736_v54 = vld [vmem:[%s5156_s3 + $0x38] sm:$0xff]  }
 0x199   :  { %v3551_v4 = vpack.i.bf16 %v594_v0, %v593_v62  ;;  %v595_v5 = vmax.f32 %v551_v2, 0.0 }
 0x19b   :  { %v3531_v8 = vpack.i.bf16 %v595_v5, %v583_v12  ;;  %3542 = vrot.lane.b32.xlu1 %v3541_v40, %s3919_s2  ;;  %v3737_v12 = vld [vmem:[%s5156_s3 + $0xc0] sm:$0xff]  }
 0x19c   :  { %v555_v10 = vpop.f32.mrb[68].mxu0 }
 0x19d   :  { %3532 = vrot.lane.b32.xlu0 %v3531_v8, %s3920_s28  ;;  %v556_v51 = vadd.f32 %v4143_v1, %v555_v10  ;;  %v557_v13 = vpop.f32.mrb[69].mxu0 }
 0x19e   :  { %v558_v14 = vpop.f32.mrb[70].mxu0 }
 0x19f   :  { %3547 = vrot.lane.b32.xlu1 %v4168_v58, %s3918_s27  ;;  %v596_v17 = vmax.f32 %v556_v51, 0.0  ;;  %v559_v18 = vadd.f32 %v4143_v1, %v558_v14  ;;  %v560_v19 = vpop.f32.mrb[71].mxu0  ;;  %v3722_v58 = vld [vmem:[%s5156_s3] sm:$0xff]  }
 0x1a0   :  { %3208 = vmatpush3.bf16.msra.mxu1 %v3722_v58  ;;  %v471_v19 = vadd.f32 %v4143_v1, %v4159_v28  ;;  %v423_v58 = vadd.f32 %v4143_v1, %v4132_v55 }
 0x1a1   :  { %3537 = vrot.lane.b32.xlu0 %v3536_v37, %s3919_s2  ;;  %v597_v20 = vmax.f32 %v559_v18, 0.0  ;;  %v3732_v37 = vld [vmem:[%s5156_s3 + $0x28] sm:$0xff]  }
 0x1a3   :  { %v3566_v22 = vpack.i.bf16 %v597_v20, %v596_v17  ;;  %3557 = vrot.lane.b32.xlu1 %v4151_v16, %s3918_s27  ;;  %v3723_v16 = vld [vmem:[%s5156_s3 + $0x48] sm:$0xff]   ;;  %v614_v35 = vpop.permute.xlu1 %613  ;;  %v519_v20 = vadd.f32 %v4143_v1, %v4176_v9  ;;  %v575_v9 = vmax.f32 %v471_v19, 0.0 }
 0x1a4   :  { %3209 = vmatprep.subr.bf16.mxu1 %v3723_v16  ;;  %v428_v16 = vadd.f32 %v4143_v1, %v4134_v57 }
 0x1a5   :  { %605 = vrot.lane.b32.xlu0 %v567_v21, %s3919_s2  ;;  %v524_v21 = vadd.f32 %v4143_v1, %v4178_v11 }
 0x1a7   :  { %3567 = vrot.lane.b32.xlu1 %v3566_v22, %s3920_s28 }
 0x1a9   :  { %3552 = vrot.lane.b32.xlu0 %v3551_v4, %s3918_s27 }
 0x1ad   :  { %3562 = vrot.lane.b32.xlu0 %v4172_v6, %s3920_s28  ;;  %v3724_v6 = vld [vmem:[%s5156_s3 + $0x8] sm:$0xff]  }
 0x1ae   :  { %3210 = vmatpush3.bf16.msra.mxu1 %v3724_v6 }
 0x1b1   :  { %3572 = vrot.lane.b32.xlu0 %v4155_v25, %s3920_s28  ;;  %v3725_v25 = vld [vmem:[%s5156_s3 + $0x50] sm:$0xff]  }
 0x1b2   :  { %3211 = vmatprep.subr.bf16.mxu1 %v3725_v25 }
 0x1b3   :  { %3212 = vmatpush3.bf16.msra.mxu1 %v3726_v23 }
 0x1b4   :  { %3213 = vmatprep.subr.bf16.mxu1 %v3727_v24  ;;  %v587_v24 = vmax.f32 %v519_v20, 0.0 }
 0x1b7   :  { %3214 = vmatpush3.bf16.msra.mxu1 %v3728_v27  ;;  %v588_v27 = vmax.f32 %v524_v21, 0.0 }
 0x1b8   :  { %3215 = vmatprep.subr.bf16.mxu1 %v3729_v31 }
 0x1bb   :  { %3216 = vmatpush3.bf16.msra.mxu1 %v3730_v32 }
 0x1bc   :  { %3217 = vmatprep.subr.bf16.mxu1 %v3731_v33 }
 0x1bf   :  { %3218 = vmatpush3.bf16.msra.mxu1 %v3732_v37  ;;  %v564_v37 = vmax.f32 %v428_v16, 0.0 }
 0x1c0   :  { %3219 = vmatprep.subr.bf16.mxu1 %v3733_v39 }
 0x1c3   :  { %3220 = vmatpush3.bf16.msra.mxu1 %v3734_v41  ;;  %v3746_v41 = vld [vmem:[%s5156_s3 + $0x300] sm:$0xff]  }
 0x1c4   :  { %3221 = vmatprep.subr.bf16.mxu1 %v3735_v52 }
 0x1c7   :  { %3222 = vmatpush3.bf16.msra.mxu1 %v3736_v54 }
 0x1c8   :  { %3235 = vmatprep.subr.bf16.mxu1 %v3737_v12 }
 0x1cd   :  { %v4235_v29 = vpop.permute.xlu0 %3517 }
 0x1ce   :  { %v3519_v36 = vunpack.i.l.bf16 %v4235_v29  ;;  %v3520_v23 = vunpack.i.h.bf16 %v4235_v29 }
 0x1d0   :  { %v707_v53 = vsel %vm706_vm0, %v562_v38, %v3519_v36  ;;  %v563_v36 = vmax.f32 %v423_v58, 0.0  ;;  %v719_v39 = vsel %vm706_vm0, %v575_v9, %v3520_v23 }
 0x1d1   :  { %v711_v44 = vsel %vm710_vm1, %v707_v53, %v614_v35  ;;  %v3745_v53 = vld [vmem:[%s5156_s3 + $0x340] sm:$0xff]  }
 0x1d2   :  { %3375 = vmatprep.subr.bf16.mxu0 %v3745_v53  ;;  %v3765_v53 = vld [vmem:[%s5156_s3 + $0x368] sm:$0xff]  }
 0x1d3   :  { %3376 = vmatpush3.bf16.msra.mxu0 %v3746_v41  ;;  %v3766_v41 = vld [vmem:[%s5156_s3 + $0x328] sm:$0xff]  }
 0x1f7   :  { %v3523_v61 = vpop.permute.xlu0 %3522 }
 0x1f8   :  { %v3525_v49 = vunpack.i.h.bf16 %v3523_v61  ;;  %v3524_v50 = vunpack.i.l.bf16 %v3523_v61 }
 0x1fa   :  { %v727_v62 = vsel %vm706_vm0, %v586_v59, %v3525_v49  ;;  %v718_v0 = vsel %vm706_vm0, %v574_v7, %v3524_v50 }
 0x205   :  { %v3528_v40 = vpop.permute.xlu1 %3527 }
 0x206   :  { %v3530_v26 = vunpack.i.h.bf16 %v3528_v40  ;;  %v3529_v43 = vunpack.i.l.bf16 %v3528_v40 }
 0x208   :  { %v721_v4 = vsel %vm710_vm1, %v718_v0, %v3529_v43  ;;  %v730_v5 = vsel %vm710_vm1, %v727_v62, %v3530_v26 }
 0x209   :  { %v626_v42 = vpop.permute.xlu1 %625 }
 0x20a   :  { %v4265_v47 = vsel %vm714_vm2, %v711_v44, %v626_v42 }
 0x20b   :  { %v739_v48 = vrot.slane %v4265_v47, 2 }
 0x20d   :  { %v4274_v56 = vpop.permute.xlu1 %3542  ;;  %742 = vrot.lane.b32.xlu0 %v739_v48, %s3918_s27 }
 0x20e   :  { %v3544_v28 = vunpack.i.l.bf16 %v4274_v56  ;;  %v3545_v61 = vunpack.i.h.bf16 %v4274_v56 }
 0x20f   :  { %v3533_v60 = vpop.permute.xlu0 %3532 }
 0x210   :  { %v3535_v2 = vunpack.i.h.bf16 %v3533_v60  ;;  %v3534_v3 = vunpack.i.l.bf16 %v3533_v60  ;;  %v729_v57 = vsel %vm706_vm0, %v588_v27, %v3544_v28  ;;  %v708_v0 = vsel %vm706_vm0, %v563_v36, %v3545_v61 }
 0x211   :  { %v3548_v8 = vpop.permute.xlu1 %3547 }
 0x212   :  { %v4287_v10 = vsel %vm714_vm2, %v721_v4, %v3534_v3  ;;  %v4290_v51 = vsel %vm714_vm2, %v730_v5, %v3535_v2  ;;  %v3549_v34 = vunpack.i.l.bf16 %v3548_v8  ;;  %v3550_v42 = vunpack.i.h.bf16 %v3548_v8  ;;  %v3749_v4 = vld [vmem:[%s5156_s3 + $0x348] sm:$0xff]  }
 0x213   :  { %v3538_v13 = vpop.permute.xlu0 %3537  ;;  %v4293_v14 = vrot.slane %v4287_v10, 2  ;;  %v741_v15 = vrot.slane %v4290_v51, 2  ;;  %v3750_v5 = vld [vmem:[%s5156_s3 + $0x308] sm:$0xff]   ;;  %3377 = vmatprep.subr.bf16.mxu0 %v3749_v4  ;;  %v4382_v28 = vrot.slane %v4290_v51, 4  ;;  %v3636_v4 = vpack.i.bf16 %v4290_v51, %v4287_v10 }
 0x214   :  { %v3540_v6 = vunpack.i.h.bf16 %v3538_v13  ;;  %v3539_v11 = vunpack.i.l.bf16 %v3538_v13  ;;  %v722_v49 = vsel %vm710_vm1, %v719_v39, %v3549_v34  ;;  %3378 = vmatpush3.bf16.msra.mxu0 %v3750_v5 }
 0x215   :  { %v4296_v17 = vpop.permute.xlu1 %3557  ;;  %v3576_v18 = vpack.i.bf16 %v741_v15, %v4293_v14 }
 0x216   :  { %v728_v1 = vsel %vm706_vm0, %v587_v24, %v3540_v6  ;;  %v720_v29 = vsel %vm706_vm0, %v576_v30, %v3539_v11  ;;  %v3559_v50 = vunpack.i.l.bf16 %v4296_v17  ;;  %v3560_v26 = vunpack.i.h.bf16 %v4296_v17  ;;  %v3753_v6 = vld [vmem:[%s5156_s3 + $0x350] sm:$0xff]  }
 0x217   :  { %v606_v22 = vpop.permute.xlu0 %605  ;;  %3577 = vrot.lane.b32.xlu1 %v3576_v18, %s3918_s27  ;;  %v723_v43 = vsel %vm710_vm1, %v720_v29, %v3550_v42  ;;  %v4365_v18 = vrot.slane %v4287_v10, 4  ;;  %v812_v24 = vrot.slane %v4265_v47, 4  ;;  %3379 = vmatprep.subr.bf16.mxu0 %v3753_v6  ;;  %v871_v42 = vrot.slane %v4265_v47, 6 }
 0x218   :  { %v709_v59 = vsel %vm706_vm0, %v564_v37, %v606_v22  ;;  %v712_v8 = vsel %vm710_vm1, %v708_v0, %v3559_v50  ;;  %v3761_v37 = vld [vmem:[%s5156_s3 + $0x360] sm:$0xff]   ;;  %v3773_v0 = vld [vmem:[%s5156_s3 + $0x378] sm:$0xff]  }
 0x219   :  { %v3568_v25 = vpop.permute.xlu1 %3567  ;;  %v713_v19 = vsel %vm710_vm1, %v709_v59, %v3560_v26  ;;  %v3596_v30 = vpack.i.bf16 %v4382_v28, %v4365_v18 }
 0x21a   :  { %v3570_v32 = vunpack.i.h.bf16 %v3568_v25  ;;  %v3569_v33 = vunpack.i.l.bf16 %v3568_v25  ;;  %v3754_v25 = vld [vmem:[%s5156_s3 + $0x310] sm:$0xff]  }
 0x21b   :  { %v3553_v31 = vpop.permute.xlu0 %3552  ;;  %3380 = vmatpush3.bf16.msra.mxu0 %v3754_v25 }
 0x21c   :  { %v3555_v35 = vunpack.i.h.bf16 %v3553_v31  ;;  %v3554_v55 = vunpack.i.l.bf16 %v3553_v31 }
 0x21e   :  { %v732_v38 = vsel %vm710_vm1, %v729_v57, %v3555_v35  ;;  %v731_v40 = vsel %vm710_vm1, %v728_v1, %v3554_v55  ;;  %v3757_v35 = vld [vmem:[%s5156_s3 + $0x358] sm:$0xff]   ;;  %v3762_v57 = vld [vmem:[%s5156_s3 + $0x320] sm:$0xff]   ;;  %v4426_v1 = vrot.slane %v4287_v10, 6 }
 0x21f   :  { %v4330_v44 = vsel %vm714_vm2, %v731_v40, %v3569_v33  ;;  %v4333_v45 = vsel %vm714_vm2, %v732_v38, %v3570_v32  ;;  %v3563_v46 = vpop.permute.xlu0 %3562  ;;  %v3758_v55 = vld [vmem:[%s5156_s3 + $0x318] sm:$0xff]   ;;  %3381 = vmatprep.subr.bf16.mxu0 %v3757_v35  ;;  %v4432_v38 = vrot.slane %v4290_v51, 6  ;;  %v973_v35 = vpack.c.bf16 %v4382_v28, %v4382_v28 }
 0x220   :  { %v3565_v52 = vunpack.i.h.bf16 %v3563_v46  ;;  %v3564_v54 = vunpack.i.l.bf16 %v3563_v46  ;;  %v4340_v56 = vrot.slane %v4330_v44, 6  ;;  %v4343_v7 = vrot.slane %v4333_v45, 6  ;;  %3382 = vmatpush3.bf16.msra.mxu0 %v3758_v55  ;;  %v3740_v55 = vld [vmem:[%s5156_s3 + $0x88] sm:$0xff]  }
 0x221   :  { %3383 = vmatprep.subr.bf16.mxu0 %v3761_v37  ;;  %v3616_v46 = vpack.i.bf16 %v4432_v38, %v4426_v1  ;;  %v3742_v37 = vld [vmem:[%s5156_s3 + $0x90] sm:$0xff]  }
 0x222   :  { %v4347_v60 = vsel %vm714_vm2, %v722_v49, %v3564_v54  ;;  %v4350_v62 = vsel %vm714_vm2, %v723_v43, %v3565_v52  ;;  %v785_v22 = vsel %vm776_vm3, %v4340_v56, %v4343_v7  ;;  %v874_v61 = vsel %vm776_vm3, %v4432_v38, %v4340_v56  ;;  %v3769_v52 = vld [vmem:[%s5156_s3 + $0x370] sm:$0xff]  }
 0x223   :  { %v3573_v2 = vpop.permute.xlu0 %3572  ;;  %v778_v3 = vrot.slane %v4347_v60, 6  ;;  %v4355_v12 = vrot.slane %v4350_v62, 6  ;;  %v3601_v36 = vpack.i.bf16 %v4330_v44, %v4347_v60  ;;  %v3606_v39 = vpack.i.bf16 %v4333_v45, %v4350_v62  ;;  %v3770_v54 = vld [vmem:[%s5156_s3 + $0x330] sm:$0xff]  }
 0x224   :  { %v3575_v13 = vunpack.i.h.bf16 %v3573_v2  ;;  %v3574_v17 = vunpack.i.l.bf16 %v3573_v2  ;;  %3384 = vmatpush3.bf16.msra.mxu0 %v3762_v57  ;;  %v4454_v50 = vrot.slane %v4350_v62, 2  ;;  %v4468_v43 = vrot.slane %v4333_v45, 2  ;;  %v3774_v2 = vld [vmem:[%s5156_s3 + $0x338] sm:$0xff]  }
 0x225   :  { %v3581_v20 = vpack.i.bf16 %v4340_v56, %v778_v3  ;;  %v4371_v21 = vsel %vm776_vm3, %v778_v3, %v4355_v12  ;;  %v4436_v40 = vsel %vm776_vm3, %v4426_v1, %v778_v3  ;;  %3385 = vmatprep.subr.bf16.mxu0 %v3765_v53  ;;  %v4485_v5 = vrot.slane %v4350_v62, 4  ;;  %v3743_v57 = vld [vmem:[%s5156_s3 + $0xd8] sm:$0xff]  }
 0x226   :  { %v716_v63 = vsel %vm714_vm2, %v712_v8, %v3574_v17  ;;  %v4378_v58 = vsel %vm714_vm2, %v713_v19, %v3575_v13  ;;  %v3586_v16 = vpack.i.bf16 %v785_v22, %v4371_v21  ;;  %v3621_v49 = vpack.i.bf16 %v874_v61, %v4436_v40 }
 0x227   :  { %v766_v9 = vrot.slane %v716_v63, 4  ;;  %3582 = vrot.lane.b32.xlu1 %v3581_v20, %s3918_s27  ;;  %v777_v23 = vrot.slane %v716_v63, 6  ;;  %v780_v11 = vrot.slane %v4378_v58, 6  ;;  %v767_v27 = vrot.slane %v4378_v58, 4 }
 0x228   :  { %3587 = vrot.lane.b32.xlu0 %v3586_v16, %s3918_s27  ;;  %v3611_v29 = vpack.i.bf16 %v4378_v58, %v716_v63  ;;  %3386 = vmatpush3.bf16.msra.mxu0 %v3766_v41  ;;  %v3631_v59 = vpack.i.bf16 %v4468_v43, %v4454_v50  ;;  %v899_v3 = vrot.slane %v4378_v58, 2  ;;  %v4492_v8 = vrot.slane %v4333_v45, 4 }
 0x229   :  { %v4396_v31 = vsel %vm776_vm3, %v777_v23, %v780_v11  ;;  %v4399_v32 = vsel %vm759_vm4, %v812_v24, %v766_v9  ;;  %v4405_v34 = vsel %vm759_vm4, %v766_v9, %v767_v27  ;;  %v4463_v26 = vsel %vm776_vm3, %v871_v42, %v777_v23  ;;  %3387 = vmatprep.subr.bf16.mxu0 %v3769_v52  ;;  %v3747_v52 = vld [vmem:[%s5156_s3 + $0xe0] sm:$0xff]  }
 0x22a   :  { %v3591_v33 = vpack.i.bf16 %v4396_v31, %v777_v23  ;;  %v3626_v56 = vpack.i.bf16 %v4463_v26, %v871_v42  ;;  %v3641_v13 = vpack.i.bf16 %v4485_v5, %v4265_v47  ;;  %v3646_v17 = vpack.i.bf16 %v767_v27, %v4492_v8  ;;  %v3744_v42 = vld [vmem:[%s5156_s3 + $0x98] sm:$0xff]  }
 0x22c   :  { %3592 = vrot.lane.b32.xlu1 %v3591_v33, %s3918_s27  ;;  %3597 = vrot.lane.b32.xlu0 %v3596_v30, %s3918_s27  ;;  %v3738_v33 = vld [vmem:[%s5156_s3 + $0x80] sm:$0xff]   ;;  %v3739_v30 = vld [vmem:[%s5156_s3 + $0xc8] sm:$0xff]  }
 0x22d   :  { %3388 = vmatpush3.bf16.msra.mxu0 %v3770_v54 }
 0x22e   :  { %3389 = vmatprep.subr.bf16.mxu0 %v3773_v0 }
 0x230   :  { %813 = vrot.lane.b32.xlu1 %v812_v24, %s3918_s27  ;;  %3602 = vrot.lane.b32.xlu0 %v3601_v36, %s3918_s27  ;;  %v3741_v36 = vld [vmem:[%s5156_s3 + $0xd0] sm:$0xff]  }
 0x231   :  { %3390 = vmatpush3.bf16.msra.mxu0 %v3774_v2 }
 0x234   :  { %3607 = vrot.lane.b32.xlu1 %v3606_v39, %s3918_s27  ;;  %3612 = vrot.lane.b32.xlu0 %v3611_v29, %s3918_s27  ;;  %v769_v39 = vrot.slane %v4347_v60, 4 }
 0x238   :  { %3617 = vrot.lane.b32.xlu1 %v3616_v46, %s3918_s27  ;;  %3622 = vrot.lane.b32.xlu0 %v3621_v49, %s3918_s27 }
 0x23c   :  { %3627 = vrot.lane.b32.xlu1 %v3626_v56, %s3918_s27  ;;  %3632 = vrot.lane.b32.xlu0 %v3631_v59, %s3918_s27  ;;  %v771_v56 = vsel %vm759_vm4, %v769_v39, %v4485_v5 }
 0x240   :  { %900 = vrot.lane.b32.xlu1 %v899_v3, %s3918_s27  ;;  %3637 = vrot.lane.b32.xlu0 %v3636_v4, %s3918_s27 }
 0x244   :  { %3642 = vrot.lane.b32.xlu1 %v3641_v13, %s3918_s27  ;;  %3647 = vrot.lane.b32.xlu0 %v3646_v17, %s3918_s27  ;;  %v3748_v13 = vld [vmem:[%s5156_s3 + $0xa0] sm:$0xff]  }
 0x27f   :  { %v743_v63 = vpop.permute.xlu0 %742 }
 0x289   :  { %v3578_v19 = vpop.permute.xlu1 %3577 }
 0x28a   :  { %v3580_v20 = vunpack.i.h.bf16 %v3578_v19  ;;  %v3579_v22 = vunpack.i.l.bf16 %v3578_v19  ;;  %v3751_v19 = vld [vmem:[%s5156_s3 + $0xe8] sm:$0xff]  }
 0x28c   :  { %v748_v16 = vsel %vm710_vm1, %v743_v63, %v3579_v22  ;;  %v749_v6 = vsel %vm710_vm1, %v3579_v22, %v3580_v20 }
 0x28d   :  { %v758_v25 = vsel %vm756_vm5, %v4287_v10, %v749_v6  ;;  %v761_v9 = vsel %vm759_vm4, %v749_v6, %v4382_v28  ;;  %v757_v23 = vsel %vm756_vm5, %v4265_v47, %v748_v16  ;;  %v760_v11 = vsel %vm759_vm4, %v748_v16, %v4365_v18  ;;  %v3752_v16 = vld [vmem:[%s5156_s3 + $0xa8] sm:$0xff]   ;;  %v3755_v6 = vld [vmem:[%s5156_s3 + $0xf0] sm:$0xff]  }
 0x28e   :  { %v957_v24 = vpack.c.bf16 %v761_v9, %v758_v25  ;;  %v956_v27 = vpack.c.bf16 %v760_v11, %v757_v23  ;;  %v972_v28 = vpack.c.bf16 %v4365_v18, %v4365_v18  ;;  %v3787_v47 = vld [vmem:[%s5156_s3 + $0x1c8] sm:$0xff]  }
 0x290   :  { %2051 = vmatprep.mubr.bf16.mxu1 %v957_v24  ;;  %v3756_v24 = vld [vmem:[%s5156_s3 + $0xb0] sm:$0xff]  }
 0x291   :  { %2052 = vmatmul.mubr.bf16.vlgmr.msra.gmra.mrb[0].mxu1 %v956_v27  ;;  %v3759_v27 = vld [vmem:[%s5156_s3 + $0xf8] sm:$0xff]  }
 0x292   :  { %3236 = vmatpush3.bf16.msra.mxu1 %v3738_v33  ;;  %2059 = vmatprep.mubr.bf16.mxu1 %v973_v35 }
 0x293   :  { %3237 = vmatprep.subr.bf16.mxu1 %v3739_v30 }
 0x296   :  { %3238 = vmatpush3.bf16.msra.mxu1 %v3740_v55 }
 0x297   :  { %3239 = vmatprep.subr.bf16.mxu1 %v3741_v36  ;;  %v3760_v36 = vld [vmem:[%s5156_s3 + $0xb8] sm:$0xff]  }
 0x299   :  { %v3583_v29 = vpop.permute.xlu1 %3582  ;;  %2060 = vmatmul.mubr.bf16.gmra.mrb[4].mxu1 %v972_v28 }
 0x29a   :  { %v3585_v53 = vunpack.i.h.bf16 %v3583_v29  ;;  %v3584_v41 = vunpack.i.l.bf16 %v3583_v29  ;;  %3240 = vmatpush3.bf16.msra.mxu1 %v3742_v37  ;;  %v3588_v61 = vpop.permute.xlu0 %3587  ;;  %v3763_v29 = vld [vmem:[%s5156_s3 + $0x140] sm:$0xff]  }
 0x29b   :  { %v3590_v46 = vunpack.i.h.bf16 %v3588_v61  ;;  %v3589_v49 = vunpack.i.l.bf16 %v3588_v61  ;;  %3241 = vmatprep.subr.bf16.mxu1 %v3743_v57 }
 0x29c   :  { %v799_v54 = vsel %vm710_vm1, %v3584_v41, %v3585_v53 }
 0x29d   :  { %v801_v59 = vsel %vm710_vm1, %v3589_v49, %v3590_v46  ;;  %v807_v0 = vsel %vm756_vm5, %v771_v56, %v799_v54  ;;  %v868_v46 = vsel %vm759_vm4, %v4365_v18, %v769_v39  ;;  %v975_v39 = vpack.c.bf16 %v4333_v45, %v4333_v45 }
 0x29e   :  { %3242 = vmatpush3.bf16.msra.mxu1 %v3744_v42  ;;  %v3593_v2 = vpop.permute.xlu1 %3592  ;;  %v4543_v4 = vpop.permute.xlu0 %3597  ;;  %v809_v17 = vsel %vm759_vm4, %v801_v59, %v4330_v44 }
 0x29f   :  { %3243 = vmatprep.subr.bf16.mxu1 %v3747_v52  ;;  %v959_v20 = vpack.c.bf16 %v809_v17, %v807_v0  ;;  %v3595_v25 = vunpack.i.h.bf16 %v3593_v2  ;;  %v3594_v9 = vunpack.i.l.bf16 %v3593_v2  ;;  %v3599_v52 = vunpack.i.l.bf16 %v4543_v4  ;;  %v3767_v17 = vld [vmem:[%s5156_s3 + $0x148] sm:$0xff]  }
 0x2a1   :  { %2099 = vmatprep.mubr.bf16.mxu1 %v959_v20  ;;  %v798_v33 = vsel %vm710_vm1, %v3594_v9, %v3584_v41  ;;  %v800_v30 = vsel %vm710_vm1, %v3595_v25, %v3589_v49  ;;  %v3600_v49 = vunpack.i.h.bf16 %v4543_v4 }
 0x2a2   :  { %3244 = vmatpush3.bf16.msra.mxu1 %v3748_v13  ;;  %v4553_v22 = vpop.permute.xlu1 %813  ;;  %v4555_v63 = vpop.permute.xlu0 %3602  ;;  %v806_v53 = vsel %vm756_vm5, %v4405_v34, %v798_v33  ;;  %v808_v41 = vsel %vm759_vm4, %v800_v30, %v4347_v60  ;;  %v3764_v34 = vld [vmem:[%s5156_s3 + $0x100] sm:$0xff]  }
 0x2a3   :  { %3245 = vmatprep.subr.bf16.mxu1 %v3751_v19  ;;  %v958_v2 = vpack.c.bf16 %v808_v41, %v806_v53  ;;  %v3605_v19 = vunpack.i.h.bf16 %v4555_v63  ;;  %v3604_v20 = vunpack.i.l.bf16 %v4555_v63  ;;  %v820_v63 = vsel %vm710_vm1, %v3599_v52, %v3600_v49  ;;  %v3772_v49 = vld [vmem:[%s5156_s3 + $0x110] sm:$0xff]  }
 0x2a4   :  { %v4647_v53 = vrot.slane %v4347_v60, 2 }
 0x2a6   :  { %3246 = vmatpush3.bf16.msra.mxu1 %v3752_v16  ;;  %v4563_v23 = vpop.permute.xlu1 %3607  ;;  %v4565_v11 = vpop.permute.xlu0 %3612  ;;  %v4607_v16 = vrot.slane %v4330_v44, 2 }
 0x2a7   :  { %3247 = vmatprep.subr.bf16.mxu1 %v3755_v6 }
 0x2aa   :  { %3248 = vmatpush3.bf16.msra.mxu1 %v3756_v24  ;;  %v3618_v35 = vpop.permute.xlu1 %3617  ;;  %v3623_v55 = vpop.permute.xlu0 %3622 }
 0x2ab   :  { %v3620_v37 = vunpack.i.h.bf16 %v3618_v35  ;;  %v3619_v28 = vunpack.i.l.bf16 %v3618_v35  ;;  %v3625_v57 = vunpack.i.h.bf16 %v3623_v55  ;;  %3249 = vmatprep.subr.bf16.mxu1 %v3759_v27  ;;  %v3624_v61 = vunpack.i.l.bf16 %v3623_v55 }
 0x2ac   :  { %v3614_v27 = vunpack.i.l.bf16 %v4565_v11 }
 0x2ad   :  { %v888_v42 = vsel %vm710_vm1, %v3619_v28, %v3620_v37  ;;  %v890_v54 = vsel %vm710_vm1, %v3624_v61, %v3625_v57 }
 0x2ae   :  { %3250 = vmatpush3.bf16.msra.mxu1 %v3760_v36  ;;  %v3628_v56 = vpop.permute.xlu1 %3627  ;;  %v4591_v59 = vpop.permute.xlu0 %3632  ;;  %v4597_v0 = vsel %vm756_vm5, %v868_v46, %v888_v42  ;;  %v4611_v6 = vsel %vm759_vm4, %v890_v54, %v4290_v51  ;;  %v3768_v36 = vld [vmem:[%s5156_s3 + $0x108] sm:$0xff]   ;;  %v830_v42 = vsel %vm759_vm4, %v820_v63, %v4432_v38  ;;  %v930_v54 = vsel %vm756_vm5, %v741_v15, %v4607_v16  ;;  %v3775_v51 = vld [vmem:[%s5156_s3 + $0x158] sm:$0xff]  }
 0x2af   :  { %v3630_v13 = vunpack.i.h.bf16 %v3628_v56  ;;  %v3629_v18 = vunpack.i.l.bf16 %v3628_v56  ;;  %3263 = vmatprep.subr.bf16.mxu1 %v3763_v29  ;;  %v3634_v45 = vunpack.i.l.bf16 %v4591_v59  ;;  %v965_v24 = vpack.c.bf16 %v4611_v6, %v4597_v0  ;;  %v3811_v0 = vld [vmem:[%s5156_s3 + $0x268] sm:$0xff]  }
 0x2b0   :  { %v4644_v29 = vsel %vm710_vm1, %v3604_v20, %v3605_v19  ;;  %v3812_v6 = vld [vmem:[%s5156_s3 + $0x228] sm:$0xff]  }
 0x2b1   :  { %v887_v25 = vsel %vm710_vm1, %v3629_v18, %v3619_v28  ;;  %v889_v9 = vsel %vm710_vm1, %v3630_v13, %v3624_v61  ;;  %2100 = vmatmul.mubr.bf16.vlgmr.msra.gmra.mrb[8].mxu1 %v958_v2  ;;  %v828_v61 = vsel %vm756_vm5, %v4293_v14, %v820_v63  ;;  %v974_v13 = vpack.c.bf16 %v4350_v62, %v4350_v62 }
 0x2b2   :  { %v4624_v33 = vsel %vm756_vm5, %v4399_v32, %v887_v25  ;;  %v4628_v30 = vsel %vm759_vm4, %v889_v9, %v4287_v10  ;;  %2107 = vmatprep.mubr.bf16.mxu1 %v975_v39  ;;  %3264 = vmatpush3.bf16.msra.mxu1 %v3764_v34  ;;  %v901_v35 = vpop.permute.xlu1 %900  ;;  %v3638_v55 = vpop.permute.xlu0 %3637  ;;  %v3771_v10 = vld [vmem:[%s5156_s3 + $0x150] sm:$0xff]   ;;  %v4666_v34 = vsel %vm710_vm1, %v3614_v27, %v3604_v20  ;;  %v3776_v25 = vld [vmem:[%s5156_s3 + $0x118] sm:$0xff]   ;;  %v3779_v27 = vld [vmem:[%s5156_s3 + $0x168] sm:$0xff]  }
 0x2b3   :  { %v964_v37 = vpack.c.bf16 %v4628_v30, %v4624_v33  ;;  %v4638_v32 = vsel %vm710_vm1, %v901_v35, %v3634_v45  ;;  %v3640_v28 = vunpack.i.h.bf16 %v3638_v55  ;;  %v3639_v57 = vunpack.i.l.bf16 %v3638_v55  ;;  %3265 = vmatprep.subr.bf16.mxu1 %v3767_v17  ;;  %v3780_v35 = vld [vmem:[%s5156_s3 + $0x128] sm:$0xff]   ;;  %v3823_v30 = vld [vmem:[%s5156_s3 + $0x2d8] sm:$0xff]  }
 0x2b4   :  { %v938_v18 = vsel %vm759_vm4, %v4644_v29, %v930_v54  ;;  %v961_v15 = vpack.c.bf16 %v830_v42, %v828_v61  ;;  %v985_v63 = vpack.c.bf16 %v4607_v16, %v4607_v16  ;;  %v984_v55 = vpack.c.bf16 %v4647_v53, %v4647_v53  ;;  %v3785_v61 = vld [vmem:[%s5156_s3 + $0x1c0] sm:$0xff]  }
 0x2b5   :  { %v926_v41 = vsel %vm710_vm1, %v3639_v57, %v3640_v28  ;;  %v3782_v28 = vld [vmem:[%s5156_s3 + $0x130] sm:$0xff]  }
 0x2b6   :  { %3266 = vmatpush3.bf16.msra.mxu1 %v3768_v36  ;;  %v4654_v46 = vpop.permute.xlu1 %3642  ;;  %v936_v56 = vsel %vm756_vm5, %v4436_v40, %v926_v41  ;;  %v929_v40 = vsel %vm756_vm5, %v4293_v14, %v4647_v53  ;;  %v3777_v14 = vld [vmem:[%s5156_s3 + $0x160] sm:$0xff]   ;;  %v3781_v36 = vld [vmem:[%s5156_s3 + $0x170] sm:$0xff]   ;;  %v3784_v41 = vld [vmem:[%s5156_s3 + $0x138] sm:$0xff]  }
 0x2b7   :  { %v3644_v2 = vunpack.i.l.bf16 %v4654_v46  ;;  %3267 = vmatprep.subr.bf16.mxu1 %v3771_v10  ;;  %v969_v39 = vpack.c.bf16 %v938_v18, %v936_v56  ;;  %v937_v19 = vsel %vm759_vm4, %v4666_v34, %v929_v40  ;;  %v819_v10 = vsel %vm710_vm1, %v4553_v22, %v3599_v52  ;;  %v3786_v52 = vld [vmem:[%s5156_s3 + $0x180] sm:$0xff]   ;;  %v3790_v18 = vld [vmem:[%s5156_s3 + $0x190] sm:$0xff]   ;;  %v3792_v40 = vld [vmem:[%s5156_s3 + $0x198] sm:$0xff]  }
 0x2b8   :  { %v827_v42 = vsel %vm756_vm5, %v739_v48, %v819_v10  ;;  %v829_v4 = vsel %vm759_vm4, %v819_v10, %v4426_v1  ;;  %v3609_v22 = vunpack.i.l.bf16 %v4563_v23  ;;  %v977_v48 = vpack.c.bf16 %v4432_v38, %v4432_v38  ;;  %v3807_v10 = vld [vmem:[%s5156_s3 + $0x258] sm:$0xff]  }
 0x2b9   :  { %v925_v17 = vsel %vm710_vm1, %v3644_v2, %v3639_v57  ;;  %2108 = vmatmul.mubr.bf16.gmra.mrb[12].mxu1 %v974_v13  ;;  %2339 = vmatprep.mubr.bf16.mxu0 %v969_v39  ;;  %v3783_v57 = vld [vmem:[%s5156_s3 + $0x178] sm:$0xff]   ;;  %v960_v54 = vpack.c.bf16 %v829_v4, %v827_v42  ;;  %v3789_v2 = vld [vmem:[%s5156_s3 + $0x1d0] sm:$0xff]   ;;  %v858_v13 = vsel %vm756_vm5, %v4607_v16, %v4468_v43  ;;  %v3810_v42 = vld [vmem:[%s5156_s3 + $0x220] sm:$0xff]  }
 0x2ba   :  { %v935_v20 = vsel %vm756_vm5, %v4463_v26, %v925_v17  ;;  %3268 = vmatpush3.bf16.msra.mxu1 %v3772_v49  ;;  %2147 = vmatprep.mubr.bf16.mxu1 %v961_v15  ;;  %v3778_v26 = vld [vmem:[%s5156_s3 + $0x120] sm:$0xff]   ;;  %v3610_v49 = vunpack.i.h.bf16 %v4563_v23  ;;  %v3788_v23 = vld [vmem:[%s5156_s3 + $0x188] sm:$0xff]   ;;  %v864_v15 = vsel %vm756_vm5, %v4371_v21, %v4644_v29  ;;  %v3791_v39 = vld [vmem:[%s5156_s3 + $0x1d8] sm:$0xff]  }
 0x2bb   :  { %v968_v9 = vpack.c.bf16 %v937_v19, %v935_v20  ;;  %3269 = vmatprep.subr.bf16.mxu1 %v3775_v51  ;;  %v976_v51 = vpack.c.bf16 %v4426_v1, %v4426_v1  ;;  %v3793_v1 = vld [vmem:[%s5156_s3 + $0x1e0] sm:$0xff]   ;;  %v3795_v29 = vld [vmem:[%s5156_s3 + $0x1e8] sm:$0xff]   ;;  %v3797_v19 = vld [vmem:[%s5156_s3 + $0x1f0] sm:$0xff]   ;;  %v3615_v20 = vunpack.i.h.bf16 %v4565_v11  ;;  %v855_v11 = vsel %vm756_vm5, %v4647_v53, %v4454_v50 }
 0x2bc   :  { %v848_v56 = vsel %vm710_vm1, %v3609_v22, %v3610_v49  ;;  %v3794_v21 = vld [vmem:[%s5156_s3 + $0x1a0] sm:$0xff]   ;;  %v3796_v17 = vld [vmem:[%s5156_s3 + $0x1a8] sm:$0xff]   ;;  %v3814_v4 = vld [vmem:[%s5156_s3 + $0x230] sm:$0xff]  }
 0x2bd   :  { %2340 = vmatmul.mubr.bf16.vlgmr.msra.gmra.mrb[72].mxu0 %v968_v9  ;;  %v866_v38 = vsel %vm759_vm4, %v848_v56, %v858_v13  ;;  %v3799_v9 = vld [vmem:[%s5156_s3 + $0x1f8] sm:$0xff]   ;;  %v3803_v53 = vld [vmem:[%s5156_s3 + $0x248] sm:$0xff]   ;;  %v981_v56 = vpack.c.bf16 %v4330_v44, %v4330_v44  ;;  %v3821_v13 = vld [vmem:[%s5156_s3 + $0x2d0] sm:$0xff]  }
 0x2be   :  { %3270 = vmatpush3.bf16.msra.mxu1 %v3776_v25  ;;  %2347 = vmatprep.mubr.bf16.mxu0 %v985_v63  ;;  %v963_v16 = vpack.c.bf16 %v866_v38, %v864_v15  ;;  %v3798_v25 = vld [vmem:[%s5156_s3 + $0x1b0] sm:$0xff]   ;;  %v3800_v63 = vld [vmem:[%s5156_s3 + $0x1b8] sm:$0xff]   ;;  %v3825_v38 = vld [vmem:[%s5156_s3 + $0x2e0] sm:$0xff]  }
 0x2bf   :  { %3271 = vmatprep.subr.bf16.mxu1 %v3777_v14  ;;  %v847_v14 = vsel %vm710_vm1, %v3615_v20, %v3609_v22  ;;  %v3815_v49 = vld [vmem:[%s5156_s3 + $0x278] sm:$0xff]   ;;  %v3829_v15 = vld [vmem:[%s5156_s3 + $0x2f0] sm:$0xff]  }
 0x2c0   :  { %v3816_v22 = vld [vmem:[%s5156_s3 + $0x238] sm:$0xff]  }
 0x2c2   :  { %3272 = vmatpush3.bf16.msra.mxu1 %v3778_v26  ;;  %v3801_v26 = vld [vmem:[%s5156_s3 + $0x240] sm:$0xff]  }
 0x2c3   :  { %3273 = vmatprep.subr.bf16.mxu1 %v3779_v27  ;;  %v865_v27 = vsel %vm759_vm4, %v847_v14, %v855_v11  ;;  %v3835_v14 = vld [vmem:[%s5156_s3 + $0x3c8] sm:$0xff]   ;;  %v3837_v11 = vld [vmem:[%s5156_s3 + $0x3d0] sm:$0xff]  }
 0x2c5   :  { %2348 = vmatmul.mubr.bf16.gmra.mrb[76].mxu0 %v984_v55  ;;  %v3802_v55 = vld [vmem:[%s5156_s3 + $0x200] sm:$0xff]  }
 0x2c6   :  { %3274 = vmatpush3.bf16.msra.mxu1 %v3780_v35  ;;  %v863_v35 = vsel %vm756_vm5, %v4396_v31, %v4666_v34  ;;  %v3804_v31 = vld [vmem:[%s5156_s3 + $0x208] sm:$0xff]   ;;  %v3805_v34 = vld [vmem:[%s5156_s3 + $0x250] sm:$0xff]  }
 0x2c7   :  { %3275 = vmatprep.subr.bf16.mxu1 %v3781_v36  ;;  %v962_v36 = vpack.c.bf16 %v865_v27, %v863_v35  ;;  %v3838_v27 = vld [vmem:[%s5156_s3 + $0x390] sm:$0xff]   ;;  %v982_v35 = vpack.c.bf16 %v4485_v5, %v4485_v5 }
 0x2ca   :  { %3276 = vmatpush3.bf16.msra.mxu1 %v3782_v28  ;;  %v979_v28 = vpack.c.bf16 %v4468_v43, %v4468_v43  ;;  %v978_v43 = vpack.c.bf16 %v4454_v50, %v4454_v50 }
 0x2cb   :  { %3277 = vmatprep.subr.bf16.mxu1 %v3783_v57  ;;  %v3806_v57 = vld [vmem:[%s5156_s3 + $0x210] sm:$0xff]  }
 0x2ce   :  { %3278 = vmatpush3.bf16.msra.mxu1 %v3784_v41  ;;  %v3808_v41 = vld [vmem:[%s5156_s3 + $0x218] sm:$0xff]  }
 0x2cf   :  { %3291 = vmatprep.subr.bf16.mxu1 %v3785_v61  ;;  %v3809_v61 = vld [vmem:[%s5156_s3 + $0x260] sm:$0xff]  }
 0x2d1   :  { %2148 = vmatmul.mubr.bf16.vlgmr.msra.gmra.mrb[16].mxu1 %v960_v54  ;;  %v3635_v54 = vunpack.i.h.bf16 %v4591_v59  ;;  %v3822_v59 = vld [vmem:[%s5156_s3 + $0x290] sm:$0xff]  }
 0x2d2   :  { %2155 = vmatprep.mubr.bf16.mxu1 %v977_v48  ;;  %3292 = vmatpush3.bf16.msra.mxu1 %v3786_v52  ;;  %v3817_v52 = vld [vmem:[%s5156_s3 + $0x2c0] sm:$0xff]   ;;  %v3819_v48 = vld [vmem:[%s5156_s3 + $0x2c8] sm:$0xff]  }
 0x2d3   :  { %3293 = vmatprep.subr.bf16.mxu1 %v3787_v47  ;;  %v3818_v47 = vld [vmem:[%s5156_s3 + $0x280] sm:$0xff]  }
 0x2d6   :  { %3294 = vmatpush3.bf16.msra.mxu1 %v3788_v23  ;;  %v907_v23 = vsel %vm710_vm1, %v3634_v45, %v3635_v54  ;;  %v980_v45 = vpack.c.bf16 %v4347_v60, %v4347_v60  ;;  %v3826_v60 = vld [vmem:[%s5156_s3 + $0x2a0] sm:$0xff]  }
 0x2d7   :  { %3295 = vmatprep.subr.bf16.mxu1 %v3789_v2  ;;  %v3820_v2 = vld [vmem:[%s5156_s3 + $0x288] sm:$0xff]   ;;  %v914_v44 = vsel %vm756_vm5, %v4350_v62, %v907_v23  ;;  %v916_v33 = vsel %vm759_vm4, %v907_v23, %v4492_v8  ;;  %v3824_v62 = vld [vmem:[%s5156_s3 + $0x298] sm:$0xff]  }
 0x2d9   :  { %2156 = vmatmul.mubr.bf16.gmra.mrb[20].mxu1 %v976_v51  ;;  %v3828_v51 = vld [vmem:[%s5156_s3 + $0x2a8] sm:$0xff]  }
 0x2da   :  { %3296 = vmatpush3.bf16.msra.mxu1 %v3790_v18  ;;  %2195 = vmatprep.mubr.bf16.mxu1 %v963_v16  ;;  %v3827_v18 = vld [vmem:[%s5156_s3 + $0x2e8] sm:$0xff]   ;;  %v3831_v16 = vld [vmem:[%s5156_s3 + $0x2f8] sm:$0xff]  }
 0x2db   :  { %3297 = vmatprep.subr.bf16.mxu1 %v3791_v39  ;;  %v3830_v39 = vld [vmem:[%s5156_s3 + $0x2b0] sm:$0xff]  }
 0x2de   :  { %3298 = vmatpush3.bf16.msra.mxu1 %v3792_v40  ;;  %v3832_v40 = vld [vmem:[%s5156_s3 + $0x2b8] sm:$0xff]  }
 0x2df   :  { %3299 = vmatprep.subr.bf16.mxu1 %v3793_v1  ;;  %v3648_v1 = vpop.permute.xlu0 %3647 }
 0x2e0   :  { %v3649_v20 = vunpack.i.l.bf16 %v3648_v1 }
 0x2e2   :  { %3300 = vmatpush3.bf16.msra.mxu1 %v3794_v21  ;;  %v3833_v21 = vld [vmem:[%s5156_s3 + $0x3c0] sm:$0xff]  }
 0x2e3   :  { %3301 = vmatprep.subr.bf16.mxu1 %v3795_v29  ;;  %v913_v29 = vsel %vm756_vm5, %v4378_v58, %v4638_v32 }
 0x2e6   :  { %3302 = vmatpush3.bf16.msra.mxu1 %v3796_v17  ;;  %v915_v17 = vsel %vm759_vm4, %v4638_v32, %v4485_v5  ;;  %v3842_v5 = vld [vmem:[%s5156_s3 + $0x3a0] sm:$0xff]  }
 0x2e7   :  { %3303 = vmatprep.subr.bf16.mxu1 %v3797_v19  ;;  %v3645_v19 = vunpack.i.h.bf16 %v4654_v46  ;;  %v3836_v46 = vld [vmem:[%s5156_s3 + $0x388] sm:$0xff]  }
 0x2e9   :  { %v947_v32 = vsel %vm710_vm1, %v3645_v19, %v3649_v20 }
 0x2ea   :  { %3304 = vmatpush3.bf16.msra.mxu1 %v3798_v25  ;;  %v3834_v25 = vld [vmem:[%s5156_s3 + $0x380] sm:$0xff]  }
 0x2eb   :  { %3305 = vmatprep.subr.bf16.mxu1 %v3799_v9  ;;  %v966_v9 = vpack.c.bf16 %v915_v17, %v913_v29 }
 0x2ee   :  { %3306 = vmatpush3.bf16.msra.mxu1 %v3800_v63  ;;  %v983_v63 = vpack.c.bf16 %v4492_v8, %v4492_v8  ;;  %v955_v8 = vsel %vm759_vm4, %v947_v32, %v4343_v7 }
 0x2ef   :  { %3319 = vmatprep.subr.bf16.mxu1 %v3801_v26  ;;  %v953_v26 = vsel %vm756_vm5, %v4454_v50, %v947_v32  ;;  %v3840_v50 = vld [vmem:[%s5156_s3 + $0x398] sm:$0xff]  }
 0x2f1   :  { %2196 = vmatmul.mubr.bf16.vlgmr.msra.gmra.mrb[24].mxu1 %v962_v36  ;;  %v971_v36 = vpack.c.bf16 %v955_v8, %v953_v26 }
 0x2f2   :  { %2203 = vmatprep.mubr.bf16.mxu1 %v979_v28  ;;  %3320 = vmatpush3.bf16.msra.mxu1 %v3802_v55  ;;  %v3839_v55 = vld [vmem:[%s5156_s3 + $0x3d8] sm:$0xff]   ;;  %v3843_v28 = vld [vmem:[%s5156_s3 + $0x3e8] sm:$0xff]  }
 0x2f3   :  { %3321 = vmatprep.subr.bf16.mxu1 %v3803_v53  ;;  %v3841_v53 = vld [vmem:[%s5156_s3 + $0x3e0] sm:$0xff]  }
 0x2f6   :  { %3322 = vmatpush3.bf16.msra.mxu1 %v3804_v31  ;;  %v3844_v31 = vld [vmem:[%s5156_s3 + $0x3a8] sm:$0xff]  }
 0x2f7   :  { %3323 = vmatprep.subr.bf16.mxu1 %v3805_v34  ;;  %v3845_v34 = vld [vmem:[%s5156_s3 + $0x3f0] sm:$0xff]  }
 0x2f9   :  { %2204 = vmatmul.mubr.bf16.gmra.mrb[28].mxu1 %v978_v43  ;;  %v3846_v43 = vld [vmem:[%s5156_s3 + $0x3b0] sm:$0xff]  }
 0x2fa   :  { %3324 = vmatpush3.bf16.msra.mxu1 %v3806_v57  ;;  %2243 = vmatprep.mubr.bf16.mxu1 %v965_v24  ;;  %v3813_v24 = vld [vmem:[%s5156_s3 + $0x270] sm:$0xff]   ;;  %v3650_v57 = vunpack.i.h.bf16 %v3648_v1 }
 0x2fb   :  { %3325 = vmatprep.subr.bf16.mxu1 %v3807_v10  ;;  %v3847_v10 = vld [vmem:[%s5156_s3 + $0x3f8] sm:$0xff]  }
 0x2fe   :  { %3326 = vmatpush3.bf16.msra.mxu1 %v3808_v41  ;;  %v946_v41 = vsel %vm710_vm1, %v3650_v57, %v3645_v19 }
 0x2ff   :  { %3327 = vmatprep.subr.bf16.mxu1 %v3809_v61  ;;  %v3848_v61 = vld [vmem:[%s5156_s3 + $0x3b8] sm:$0xff]  }
 0x302   :  { %3328 = vmatpush3.bf16.msra.mxu1 %v3810_v42  ;;  %v952_v42 = vsel %vm756_vm5, %v899_v3, %v946_v41 }
 0x303   :  { %3329 = vmatprep.subr.bf16.mxu1 %v3811_v0  ;;  %v954_v0 = vsel %vm759_vm4, %v946_v41, %v4355_v12 }
 0x306   :  { %3330 = vmatpush3.bf16.msra.mxu1 %v3812_v6  ;;  %v970_v6 = vpack.c.bf16 %v954_v0, %v952_v42 }
 0x307   :  { %3331 = vmatprep.subr.bf16.mxu1 %v3813_v24  ;;  %v987_v24 = vpack.c.bf16 %v4343_v7, %v4343_v7  ;;  %v3034_v7 = vld [vmem:[%s5157_s4] ss:$0 sm:$0xff] }
 0x30a   :  { %3332 = vmatpush3.bf16.msra.mxu1 %v3814_v4  ;;  %v986_v4 = vpack.c.bf16 %v4355_v12, %v4355_v12 }
 0x30b   :  { %3333 = vmatprep.subr.bf16.mxu1 %v3815_v49 }
 0x30e   :  { %3334 = vmatpush3.bf16.msra.mxu1 %v3816_v22 }
 0x30f   :  { %3347 = vmatprep.subr.bf16.mxu1 %v3817_v52 }
 0x311   :  { %2244 = vmatmul.mubr.bf16.vlgmr.msra.gmra.mrb[32].mxu1 %v964_v37  ;;  %v967_v37 = vpack.c.bf16 %v916_v33, %v914_v44 }
 0x312   :  { %2251 = vmatprep.mubr.bf16.mxu1 %v981_v56  ;;  %3348 = vmatpush3.bf16.msra.mxu1 %v3818_v47 }
 0x313   :  { %3349 = vmatprep.subr.bf16.mxu1 %v3819_v48 }
 0x316   :  { %3350 = vmatpush3.bf16.msra.mxu1 %v3820_v2 }
 0x317   :  { %3351 = vmatprep.subr.bf16.mxu1 %v3821_v13 }
 0x319   :  { %2252 = vmatmul.mubr.bf16.gmra.mrb[36].mxu1 %v980_v45 }
 0x31a   :  { %3352 = vmatpush3.bf16.msra.mxu1 %v3822_v59  ;;  %2291 = vmatprep.mubr.bf16.mxu1 %v967_v37 }
 0x31b   :  { %3353 = vmatprep.subr.bf16.mxu1 %v3823_v30 }
 0x31e   :  { %3354 = vmatpush3.bf16.msra.mxu1 %v3824_v62 }
 0x31f   :  { %3355 = vmatprep.subr.bf16.mxu1 %v3825_v38 }
 0x322   :  { %3356 = vmatpush3.bf16.msra.mxu1 %v3826_v60 }
 0x323   :  { %3357 = vmatprep.subr.bf16.mxu1 %v3827_v18 }
 0x326   :  { %3358 = vmatpush3.bf16.msra.mxu1 %v3828_v51 }
 0x327   :  { %3359 = vmatprep.subr.bf16.mxu1 %v3829_v15 }
 0x32a   :  { %3360 = vmatpush3.bf16.msra.mxu1 %v3830_v39 }
 0x32b   :  { %3361 = vmatprep.subr.bf16.mxu1 %v3831_v16 }
 0x32e   :  { %3362 = vmatpush3.bf16.msra.mxu1 %v3832_v40 }
 0x32f   :  { %3403 = vmatprep.subr.bf16.mxu1 %v3833_v21 }
 0x331   :  { %2292 = vmatmul.mubr.bf16.vlgmr.msra.gmra.mrb[40].mxu1 %v966_v9 }
 0x332   :  { %2299 = vmatprep.mubr.bf16.mxu1 %v983_v63  ;;  %3404 = vmatpush3.bf16.msra.mxu1 %v3834_v25 }
 0x333   :  { %3405 = vmatprep.subr.bf16.mxu1 %v3835_v14 }
 0x336   :  { %3406 = vmatpush3.bf16.msra.mxu1 %v3836_v46 }
 0x337   :  { %3407 = vmatprep.subr.bf16.mxu1 %v3837_v11 }
 0x339   :  { %2300 = vmatmul.mubr.bf16.gmra.mrb[44].mxu1 %v982_v35 }
 0x33a   :  { %3408 = vmatpush3.bf16.msra.mxu1 %v3838_v27  ;;  %2387 = vmatprep.mubr.bf16.mxu1 %v971_v36 }
 0x33b   :  { %3409 = vmatprep.subr.bf16.mxu1 %v3839_v55 }
 0x33e   :  { %3410 = vmatpush3.bf16.msra.mxu1 %v3840_v50 }
 0x33f   :  { %3411 = vmatprep.subr.bf16.mxu1 %v3841_v53 }
 0x342   :  { %3412 = vmatpush3.bf16.msra.mxu1 %v3842_v5 }
 0x343   :  { %3413 = vmatprep.subr.bf16.mxu1 %v3843_v28 }
 0x346   :  { %3414 = vmatpush3.bf16.msra.mxu1 %v3844_v31 }
 0x347   :  { %3415 = vmatprep.subr.bf16.mxu1 %v3845_v34 }
 0x34a   :  { %3416 = vmatpush3.bf16.msra.mxu1 %v3846_v43 }
 0x34b   :  { %3417 = vmatprep.subr.bf16.mxu1 %v3847_v10 }
 0x34e   :  { %3418 = vmatpush3.bf16.msra.mxu1 %v3848_v61 }
 0x351   :  { %2388 = vmatmul.mubr.bf16.vlgmr.msra.gmra.mrb[48].mxu1 %v970_v6 }
 0x352   :  { %2395 = vmatprep.mubr.bf16.mxu1 %v987_v24 }
 0x359   :  { %2396 = vmatmul.mubr.bf16.gmra.mrb[52].mxu1 %v986_v4 }
 0x364   :  { %v3223_v49 = vpop.f32.mrb[0].mxu1 }
 0x365   :  { %v3224_v22 = vpop.f32.mrb[1].mxu1 }
 0x366   :  { %v3225_v52 = vadd.f32 %v3224_v22, %v3223_v49  ;;  %v3226_v58 = vpop.f32.mrb[2].mxu1 }
 0x367   :  { %v3227_v54 = vpop.f32.mrb[3].mxu1 }
 0x368   :  { %v3228_v3 = vadd.f32 %v3227_v54, %v3226_v58  ;;  %v2054_v33 = vadd.f32 %v3225_v52, %v3034_v7 }
 0x36a   :  { %v2057_v30 = vadd.f32 %v3228_v3, %v3034_v7 }
 0x36c   :  { %v3229_v47 = vpop.f32.mrb[4].mxu1 }
 0x36d   :  { %v3230_v48 = vpop.f32.mrb[5].mxu1 }
 0x36e   :  { %v3231_v56 = vadd.f32 %v3230_v48, %v3229_v47  ;;  %v3232_v23 = vpop.f32.mrb[6].mxu1 }
 0x36f   :  { %v3233_v2 = vpop.f32.mrb[7].mxu1 }
 0x370   :  { %v2062_v51 = vadd.f32 %v3231_v56, %v3034_v7 }
 0x384   :  { %v3251_v13 = vpop.f32.mrb[8].mxu1 }
 0x385   :  { %v3252_v44 = vpop.f32.mrb[9].mxu1 }
 0x386   :  { %v3253_v12 = vadd.f32 %v3252_v44, %v3251_v13  ;;  %v3254_v59 = vpop.f32.mrb[10].mxu1 }
 0x387   :  { %v3255_v45 = vpop.f32.mrb[11].mxu1 }
 0x388   :  { %v2102_v37 = vadd.f32 %v3253_v12, %v2054_v33  ;;  %v3256_v62 = vadd.f32 %v3255_v45, %v3254_v59 }
 0x38a   :  { %v2105_v38 = vadd.f32 %v3256_v62, %v2057_v30 }
 0x38c   :  { %v3257_v60 = vpop.f32.mrb[12].mxu1 }
 0x38d   :  { %v3258_v18 = vpop.f32.mrb[13].mxu1 }
 0x38e   :  { %v3259_v15 = vadd.f32 %v3258_v18, %v3257_v60  ;;  %v3260_v39 = vpop.f32.mrb[14].mxu1 }
 0x38f   :  { %v3261_v16 = vpop.f32.mrb[15].mxu1 }
 0x390   :  { %v2110_v40 = vadd.f32 %v3259_v15, %v2062_v51  ;;  %v3391_v1 = vpop.f32.mrb[72].mxu0 }
 0x391   :  { %v3392_v21 = vpop.f32.mrb[73].mxu0 }
 0x392   :  { %v3393_v29 = vadd.f32 %v3392_v21, %v3391_v1  ;;  %v3394_v17 = vpop.f32.mrb[74].mxu0 }
 0x393   :  { %v3395_v19 = vpop.f32.mrb[75].mxu0 }
 0x394   :  { %v3396_v20 = vadd.f32 %v3395_v19, %v3394_v17 }
 0x398   :  { %v3397_v25 = vpop.f32.mrb[76].mxu0 }
 0x399   :  { %v3398_v9 = vpop.f32.mrb[77].mxu0 }
 0x39a   :  { %v3399_v14 = vadd.f32 %v3398_v9, %v3397_v25  ;;  %v3400_v63 = vpop.f32.mrb[78].mxu0 }
 0x39b   :  { %v3401_v32 = vpop.f32.mrb[79].mxu0 }
 0x3a4   :  { %v3279_v46 = vpop.f32.mrb[16].mxu1 }
 0x3a5   :  { %v3280_v11 = vpop.f32.mrb[17].mxu1 }
 0x3a6   :  { %v3281_v26 = vadd.f32 %v3280_v11, %v3279_v46  ;;  %v3282_v8 = vpop.f32.mrb[18].mxu1 }
 0x3a7   :  { %v3283_v27 = vpop.f32.mrb[19].mxu1 }
 0x3a8   :  { %v2150_v35 = vadd.f32 %v3281_v26, %v2102_v37  ;;  %v3284_v55 = vadd.f32 %v3283_v27, %v3282_v8 }
 0x3aa   :  { %v2153_v36 = vadd.f32 %v3284_v55, %v2105_v38 }
 0x3ac   :  { %v3285_v50 = vpop.f32.mrb[20].mxu1 }
 0x3ad   :  { %v3286_v53 = vpop.f32.mrb[21].mxu1 }
 0x3ae   :  { %v3287_v5 = vadd.f32 %v3286_v53, %v3285_v50  ;;  %v3288_v28 = vpop.f32.mrb[22].mxu1  ;;  %v3852_v53 = vld [vmem:[%s5158_s5 + $0x80] sm:$0xff]  }
 0x3af   :  { %v3289_v31 = vpop.f32.mrb[23].mxu1  ;;  %v3854_v28 = vld [vmem:[%s5158_s5 + $0xc8] sm:$0xff]  }
 0x3b0   :  { %v2158_v34 = vadd.f32 %v3287_v5, %v2110_v40  ;;  %v3853_v5 = vld [vmem:[%s5158_s5 + $0x48] sm:$0xff]  }
 0x3c4   :  { %v3307_v57 = vpop.f32.mrb[24].mxu1 }
 0x3c5   :  { %v3308_v43 = vpop.f32.mrb[25].mxu1 }
 0x3c6   :  { %v3309_v10 = vadd.f32 %v3308_v43, %v3307_v57  ;;  %v3310_v41 = vpop.f32.mrb[26].mxu1 }
 0x3c7   :  { %v3311_v61 = vpop.f32.mrb[27].mxu1 }
 0x3c8   :  { %v2198_v42 = vadd.f32 %v3309_v10, %v2150_v35  ;;  %v3312_v0 = vadd.f32 %v3311_v61, %v3310_v41  ;;  %v3855_v41 = vld [vmem:[%s5158_s5 + $0x8] sm:$0xff]  }
 0x3c9   :  { %v3856_v61 = vld [vmem:[%s5158_s5 + $0x88] sm:$0xff]  }
 0x3ca   :  { %v2201_v6 = vadd.f32 %v3312_v0, %v2153_v36  ;;  %v3857_v0 = vld [vmem:[%s5158_s5 + $0x50] sm:$0xff]  }
 0x3cc   :  { %v3313_v24 = vpop.f32.mrb[28].mxu1 }
 0x3cd   :  { %v3314_v4 = vpop.f32.mrb[29].mxu1 }
 0x3ce   :  { %v3315_v49 = vadd.f32 %v3314_v4, %v3313_v24  ;;  %v3316_v22 = vpop.f32.mrb[30].mxu1 }
 0x3cf   :  { %v3317_v52 = vpop.f32.mrb[31].mxu1  ;;  %v3859_v22 = vld [vmem:[%s5158_s5 + $0x10] sm:$0xff]  }
 0x3d0   :  { %v2206_v58 = vadd.f32 %v3315_v49, %v2158_v34  ;;  %v3860_v52 = vld [vmem:[%s5158_s5 + $0x90] sm:$0xff]  }
 0x3e4   :  { %v3335_v54 = vpop.f32.mrb[32].mxu1 }
 0x3e5   :  { %v3336_v3 = vpop.f32.mrb[33].mxu1 }
 0x3e6   :  { %v3337_v47 = vadd.f32 %v3336_v3, %v3335_v54  ;;  %v3338_v48 = vpop.f32.mrb[34].mxu1  ;;  %v3862_v54 = vld [vmem:[%s5158_s5 + $0xd8] sm:$0xff]  }
 0x3e7   :  { %v3339_v56 = vpop.f32.mrb[35].mxu1 }
 0x3e8   :  { %v2246_v23 = vadd.f32 %v3337_v47, %v2198_v42  ;;  %v3340_v2 = vadd.f32 %v3339_v56, %v3338_v48  ;;  %v3863_v56 = vld [vmem:[%s5158_s5 + $0x18] sm:$0xff]  }
 0x3ea   :  { %v2249_v7 = vadd.f32 %v3340_v2, %v2201_v6  ;;  %v3858_v6 = vld [vmem:[%s5158_s5 + $0xd0] sm:$0xff]  }
 0x3ec   :  { %v3341_v13 = vpop.f32.mrb[36].mxu1 }
 0x3ed   :  { %v3342_v44 = vpop.f32.mrb[37].mxu1 }
 0x3ee   :  { %v3343_v33 = vadd.f32 %v3342_v44, %v3341_v13  ;;  %v3344_v12 = vpop.f32.mrb[38].mxu1  ;;  %v3866_v13 = vld [vmem:[%s5158_s5 + $0xe0] sm:$0xff]  }
 0x3ef   :  { %v3345_v59 = vpop.f32.mrb[39].mxu1  ;;  %v3867_v44 = vld [vmem:[%s5158_s5 + $0x20] sm:$0xff]   ;;  %v3869_v12 = vld [vmem:[%s5158_s5 + $0x68] sm:$0xff]  }
 0x3f0   :  { %v2254_v45 = vadd.f32 %v3343_v33, %v2206_v58  ;;  %v3861_v58 = vld [vmem:[%s5158_s5 + $0x58] sm:$0xff]   ;;  %v3868_v33 = vld [vmem:[%s5158_s5 + $0xa0] sm:$0xff]   ;;  %v3870_v59 = vld [vmem:[%s5158_s5 + $0xe8] sm:$0xff]  }
 0x404   :  { %v3363_v30 = vpop.f32.mrb[40].mxu1 }
 0x405   :  { %v3364_v37 = vpop.f32.mrb[41].mxu1 }
 0x406   :  { %v3365_v62 = vadd.f32 %v3364_v37, %v3363_v30  ;;  %v3366_v38 = vpop.f32.mrb[42].mxu1  ;;  %v3872_v30 = vld [vmem:[%s5158_s5 + $0xa8] sm:$0xff]   ;;  %v3873_v37 = vld [vmem:[%s5158_s5 + $0x70] sm:$0xff]  }
 0x407   :  { %v3367_v60 = vpop.f32.mrb[43].mxu1 }
 0x408   :  { %v2294_v18 = vadd.f32 %v3365_v62, %v2246_v23  ;;  %v3368_v51 = vadd.f32 %v3367_v60, %v3366_v38  ;;  %v3864_v23 = vld [vmem:[%s5158_s5 + $0x98] sm:$0xff]   ;;  %v3874_v62 = vld [vmem:[%s5158_s5 + $0xf0] sm:$0xff]  }
 0x409   :  { %v3875_v38 = vld [vmem:[%s5158_s5 + $0x30] sm:$0xff]  }
 0x40a   :  { %v2297_v15 = vadd.f32 %v3368_v51, %v2249_v7  ;;  %v2342_v39 = vadd.f32 %v3393_v29, %v2294_v18  ;;  %v3849_v29 = vld [vmem:[%s5158_s5 + $0x40] sm:$0xff]   ;;  %v3876_v60 = vld [vmem:[%s5158_s5 + $0xb0] sm:$0xff]   ;;  %v3877_v18 = vld [vmem:[%s5158_s5 + $0x78] sm:$0xff]  }
 0x40b   :  { %3431 = vmatprep.subr.bf16.mxu0 %v3849_v29  ;;  %v3865_v7 = vld [vmem:[%s5158_s5 + $0x60] sm:$0xff]   ;;  %v3878_v51 = vld [vmem:[%s5158_s5 + $0xf8] sm:$0xff]  }
 0x40c   :  { %v3369_v16 = vpop.f32.mrb[44].mxu1  ;;  %v2345_v40 = vadd.f32 %v3396_v20, %v2297_v15  ;;  %v3850_v20 = vld [vmem:[%s5158_s5 + $0xc0] sm:$0xff]   ;;  %v3879_v15 = vld [vmem:[%s5158_s5 + $0x38] sm:$0xff]  }
 0x40d   :  { %v3370_v1 = vpop.f32.mrb[45].mxu1  ;;  %3453 = vmatprep.subr.bf16.mxu1 %v3850_v20 }
 0x40e   :  { %v3371_v21 = vadd.f32 %v3370_v1, %v3369_v16  ;;  %v3372_v17 = vpop.f32.mrb[46].mxu1  ;;  %3454 = vmatpush3.bf16.msra.mxu1 %v3852_v53  ;;  %v3921_v16 = vmov 0.0   ;;  %v3888_v53 = vld [vmem:[%s5160_s7 + $0x18] sm:$0xff]  }
 0x40f   :  { %v3373_v19 = vpop.f32.mrb[47].mxu1  ;;  %3455 = vmatprep.subr.bf16.mxu1 %v3854_v28 }
 0x410   :  { %v2302_v25 = vadd.f32 %v3371_v21, %v2254_v45  ;;  %v3871_v45 = vld [vmem:[%s5158_s5 + $0x28] sm:$0xff]  }
 0x412   :  { %v2350_v9 = vadd.f32 %v3399_v14, %v2302_v25  ;;  %v3851_v14 = vld [vmem:[%s5158_s5] sm:$0xff]   ;;  %3456 = vmatpush3.bf16.msra.mxu1 %v3856_v61 }
 0x413   :  { %3432 = vmatpush3.bf16.msra.mxu0 %v3851_v14  ;;  %3457 = vmatprep.subr.bf16.mxu1 %v3858_v6  ;;  %v3885_v14 = vld [vmem:[%s5160_s7] sm:$0xff]  }
 0x414   :  { %3433 = vmatprep.subr.bf16.mxu0 %v3853_v5 }
 0x416   :  { %3458 = vmatpush3.bf16.msra.mxu1 %v3860_v52 }
 0x417   :  { %3434 = vmatpush3.bf16.msra.mxu0 %v3855_v41  ;;  %3459 = vmatprep.subr.bf16.mxu1 %v3862_v54 }
 0x418   :  { %3435 = vmatprep.subr.bf16.mxu0 %v3857_v0 }
 0x41a   :  { %3460 = vmatpush3.bf16.msra.mxu1 %v3864_v23 }
 0x41b   :  { %3436 = vmatpush3.bf16.msra.mxu0 %v3859_v22  ;;  %3461 = vmatprep.subr.bf16.mxu1 %v3866_v13 }
 0x41c   :  { %3437 = vmatprep.subr.bf16.mxu0 %v3861_v58 }
 0x41e   :  { %3462 = vmatpush3.bf16.msra.mxu1 %v3868_v33 }
 0x41f   :  { %3438 = vmatpush3.bf16.msra.mxu0 %v3863_v56  ;;  %3463 = vmatprep.subr.bf16.mxu1 %v3870_v59 }
 0x420   :  { %3439 = vmatprep.subr.bf16.mxu0 %v3865_v7 }
 0x422   :  { %3464 = vmatpush3.bf16.msra.mxu1 %v3872_v30 }
 0x423   :  { %3440 = vmatpush3.bf16.msra.mxu0 %v3867_v44  ;;  %3465 = vmatprep.subr.bf16.mxu1 %v3874_v62 }
 0x424   :  { %v3419_v63 = vpop.f32.mrb[48].mxu1  ;;  %3441 = vmatprep.subr.bf16.mxu0 %v3869_v12 }
 0x425   :  { %v3420_v32 = vpop.f32.mrb[49].mxu1 }
 0x426   :  { %v3421_v46 = vadd.f32 %v3420_v32, %v3419_v63  ;;  %v3422_v11 = vpop.f32.mrb[50].mxu1  ;;  %3466 = vmatpush3.bf16.msra.mxu1 %v3876_v60 }
 0x427   :  { %v3423_v26 = vpop.f32.mrb[51].mxu1  ;;  %3442 = vmatpush3.bf16.msra.mxu0 %v3871_v45  ;;  %3467 = vmatprep.subr.bf16.mxu1 %v3878_v51 }
 0x428   :  { %v4990_v8 = vadd.f32 %v3421_v46, %v2342_v39  ;;  %v3424_v27 = vadd.f32 %v3423_v26, %v3422_v11  ;;  %3443 = vmatprep.subr.bf16.mxu0 %v3873_v37  ;;  %v3880_v39 = vld [vmem:[%s5158_s5 + $0xb8] sm:$0xff]   ;;  %v3881_v26 = vld [vmem:[%s5158_s5 + $0x100] sm:$0xff]  }
 0x42a   :  { %v2403_v35 = vmax.f32 %v4990_v8, 0.0  ;;  %v2393_v55 = vadd.f32 %v3424_v27, %v2345_v40  ;;  %3468 = vmatpush3.bf16.msra.mxu1 %v3880_v39  ;;  %v3882_v27 = vld [vmem:[%s5158_s5 + $0x108] sm:$0xff]  }
 0x42b   :  { %3444 = vmatpush3.bf16.msra.mxu0 %v3875_v38 }
 0x42c   :  { %v2404_v36 = vmax.f32 %v2393_v55, 0.0  ;;  %v3425_v50 = vpop.f32.mrb[52].mxu1  ;;  %v2408_v34 = vrot.slane %v2403_v35, 6  ;;  %3445 = vmatprep.subr.bf16.mxu0 %v3877_v18  ;;  %v3884_v55 = vld [vmem:[%s5158_s5 + $0x118] sm:$0xff]  }
 0x42d   :  { %v3426_v31 = vpop.f32.mrb[53].mxu1 }
 0x42e   :  { %v2409_v57 = vrot.slane %v2404_v36, 6  ;;  %v3427_v43 = vadd.f32 %v3426_v31, %v3425_v50  ;;  %v3428_v10 = vpop.f32.mrb[54].mxu1  ;;  %v2415_v3 = vrot.slane %v2404_v36, 4  ;;  %v3886_v36 = vld [vmem:[%s5160_s7 + $0x8] sm:$0xff]   ;;  %v3887_v50 = vld [vmem:[%s5160_s7 + $0x10] sm:$0xff]  }
 0x42f   :  { %v3429_v42 = vpop.f32.mrb[55].mxu1  ;;  %3446 = vmatpush3.bf16.msra.mxu0 %v3879_v15 }
 0x430   :  { %v2398_v24 = vadd.f32 %v3427_v43, %v2350_v9  ;;  %v2410_v4 = vsel %vm776_vm3, %v2408_v34, %v2409_v57  ;;  %3485 = vmatprep.subr.bf16.mxu0 %v3921_v16  ;;  %v3163_v57 = vld [vmem:[%s5159_s6] ss:$0 sm:$0xff]  ;;  %s3923_s6 = smov [#allocation2]  }
 0x431   :  { %2411 = vrot.lane.b32.xlu1 %v2410_v4, %s3918_s27 }
 0x432   :  { %v2405_v49 = vmax.f32 %v2398_v24, 0.0 }
 0x434   :  { %v2416_v47 = vrot.slane %v2405_v49, 4 }
 0x436   :  { %v5040_v48 = vsel %vm759_vm4, %v2415_v3, %v2416_v47  ;;  %v3201_v47 = vld [vmem:[%s5161_s8] ss:$0 sm:$0xff]  ;;  %s2973_s8 = sshll.u32 %s3923_s6, 4  ;;  %s2974_s8 = int_to_ptr.vmem [resolvable:$true] %s2973_s8 }
 0x437   :  { %v2422_v2 = vrot.slane %v5040_v48, 2  ;;  %v2431_v29 = vrot.slane %v5040_v48, 4  ;;  %s3893_s16 = scalar_lea.vmem %s2974_s8, 32  ;;  %p3898_p1 = scmp.lt.s32.totalorder %s2974_s8, %s2974_s8 }
 0x438   :  { %p3894_p0 = scmp.ne.s32.totalorder %s2974_s8, %s3893_s16  ;;  %p3899_p2 = scmp.lt.s32.totalorder %s3893_s16, %s3893_s16 }
 0x439   :  { %2425 = vrot.lane.b32.xlu1 %v2422_v2, %s3918_s27  ;;  %v2439_v20 = vpack.c.bf16 %v2431_v29, %v2431_v29 }
 0x43a   :  { %p3900_p3 = por %p3899_p2, %p3898_p1 }
 0x43c   :  { %p3901_p4 = pnand %p3900_p3, %p3894_p0 }
 0x4a3   :  { %v2412_v40 = vpop.permute.xlu1 %2411 }
 0x4a4   :  { %v2419_v1 = vsel %vm710_vm1, %v2403_v35, %v2412_v40  ;;  %v3883_v35 = vld [vmem:[%s5158_s5 + $0x110] sm:$0xff]  }
 0x4a5   :  { %v2430_v21 = vrot.slane %v2419_v1, 4  ;;  %v2421_v17 = vrot.slane %v2419_v1, 2  ;;  %v2435_v8 = vpack.c.bf16 %v2419_v1, %v2419_v1 }
 0x4a7   :  { %2423 = vrot.lane.b32.xlu0 %v2421_v17, %s3918_s27  ;;  %v2438_v19 = vpack.c.bf16 %v2430_v21, %v2430_v21 }
 0x4a9   :  { %2810 = vmatprep.mubr.bf16.mxu1 %v2438_v19 }
 0x4ab   :  { %v2426_v25 = vpop.permute.xlu1 %2425 }
 0x519   :  { %v2424_v9 = vpop.permute.xlu0 %2423 }
 0x51a   :  { %v2427_v63 = vsel %vm710_vm1, %v2424_v9, %v2426_v25  ;;  %v2434_v32 = vsel %vm710_vm1, %v5040_v48, %v2424_v9 }
 0x51b   :  { %v2436_v46 = vpack.c.bf16 %v2434_v32, %v2434_v32  ;;  %v2437_v11 = vpack.c.bf16 %v2427_v63, %v2427_v63 }
 0x51d   :  { %2770 = vmatprep.mubr.bf16.mxu0 %v2436_v46  ;;  %2811 = vmatmul.mubr.bf16.vlgmr.msra.gmra.mrb[56].mxu1 %v2437_v11 }
 0x51e   :  { %2771 = vmatmul.mubr.bf16.vlgmr.msra.gmra.mrb[80].mxu0 %v2435_v8 }
 0x51f   :  { %3486 = vmatpush3.bf16.msra.mxu0 %v3881_v26  ;;  %3493 = vmatprep.mubr.msk.bf16.mxu0 %vm3922_vm6, %v3921_v16 }
 0x520   :  { %3487 = vmatprep.subr.bf16.mxu0 %v3921_v16 }
 0x523   :  { %3488 = vmatpush3.bf16.msra.mxu0 %v3882_v27 }
 0x524   :  { %3489 = vmatprep.subr.bf16.mxu0 %v3921_v16 }
 0x527   :  { %3490 = vmatpush3.bf16.msra.mxu0 %v3883_v35 }
 0x528   :  { %3491 = vmatprep.subr.bf16.mxu0 %v3921_v16 }
 0x52b   :  { %3492 = vmatpush3.bf16.msra.mxu0 %v3884_v55 }
 0x52c   :  { %3497 = vmatprep.subr.bf16.mxu0 %v3921_v16 }
 0x52e   :  { %3494 = vmatmul.mubr.msk.bf16.vlgmr.msra.gmra.mrb[84].mxu0 %vm710_vm1, %v2439_v20 }
 0x52f   :  { %3505 = vmatprep.mubr.msk.bf16.mxu0 %vm3922_vm6, %v3921_v16  ;;  %3498 = vmatpush3.bf16.msra.mxu0 %v3885_v14 }
 0x530   :  { %3499 = vmatprep.subr.bf16.mxu0 %v3921_v16 }
 0x533   :  { %3500 = vmatpush3.bf16.msra.mxu0 %v3886_v36 }
 0x534   :  { %3501 = vmatprep.subr.bf16.mxu0 %v3921_v16 }
 0x537   :  { %3502 = vmatpush3.bf16.msra.mxu0 %v3887_v50 }
 0x538   :  { %3503 = vmatprep.subr.bf16.mxu0 %v3921_v16 }
 0x53b   :  { %3504 = vmatpush3.bf16.msra.mxu0 %v3888_v53 }
 0x5f0   :  { %v3469_v5 = vpop.f32.mrb[56].mxu1 }
 0x5f1   :  { %v3447_v28 = vpop.f32.mrb[80].mxu0  ;;  %v3470_v31 = vpop.f32.mrb[57].mxu1 }
 0x5f2   :  { %v3471_v34 = vadd.f32 %v3470_v31, %v3469_v5  ;;  %v3448_v43 = vpop.f32.mrb[81].mxu0  ;;  %v3472_v10 = vpop.f32.mrb[58].mxu1 }
 0x5f3   :  { %v3449_v41 = vadd.f32 %v3448_v43, %v3447_v28  ;;  %v3450_v61 = vpop.f32.mrb[82].mxu0  ;;  %v3473_v42 = vpop.f32.mrb[59].mxu1 }
 0x5f4   :  { %v3451_v0 = vpop.f32.mrb[83].mxu0 }
 0x5f5   :  { %v2773_v6 = vadd.f32 %v3449_v41, %v3163_v57 }
 0x5f7   :  { %v2813_v24 = vadd.f32 %v3471_v34, %v2773_v6 }
 0x601   :  { %v2852_v4 = vpop.f32.mrb[84].mxu0 }
 0x602   :  { %v2853_v49 = vadd.f32 %v2852_v4, %v2813_v24  ;;  %v3495_v22 = vpop.f32.mrb[85].mxu0 }
 0x603   :  { %v2855_v52 = vpop.f32.mrb[86].mxu0 }
 0x604   :  { %v2858_v58 = vmax.f32 %v2853_v49, 0.0  ;;  %v3496_v54 = vpop.f32.mrb[87].mxu0 }
 0x606   :  { %v2859_v3 = vpack.c.bf16 %v2858_v58, %v2858_v58 }
 0x608   :  { %3506 = vmatmul.mubr.msk.bf16.vlgmr.msra.gmra.mrb[88].mxu0 %vm710_vm1, %v2859_v3 }
 0x6db   :  { %v2936_v48 = vpop.f32.mrb[88].mxu0 }
 0x6dc   :  { %v2937_v56 = vadd.f32 %v3201_v47, %v2936_v48  ;;  %v3507_v23 = vpop.f32.mrb[89].mxu0 }
 0x6dd   :  { %v2939_v2 = vpop.f32.mrb[90].mxu0 }
 0x6de   :  { %v2942_v7 = vmax.f32 %v2937_v56, 0.0  ;;  %v3508_v13 = vpop.f32.mrb[91].mxu0 }
 0x6e0   :  { %v2944_v44 = vsel %vm2943_vm7, %v2942_v7, 0.0 }
 0x6e1   :  { %2945 = vadd.xlane.f32.xlu0 %v2944_v44 }
 0x76e   :  { %v2946_v33 = vpop.xlane.xlu0 %2945 }
 0x76f   :  { %v2948_v12 = vmul.f32 0.03125, %v2946_v33 }
 0x771   :  { %v2949_v59 = vsub.f32 %v2942_v7, %v2948_v12 }
 0x773   :  { %v2950_v45 = vmul.f32 %v2949_v59, %v2949_v59 }
 0x775   :  { %v2951_v30 = vsel %vm2943_vm7, %v2950_v45, 0.0 }
 0x776   :  { %2952 = vadd.xlane.f32.xlu1 %v2951_v30 }
 0x803   :  { %v2953_v37 = vpop.xlane.xlu1 %2952 }
 0x804   :  { %v2955_v62 = vmul.f32 0.032258064, %v2953_v37 }
 0x806   :  { %3889 = vrsqrt.f32 %v2955_v62  ;;  %vm2958_vm8 = vcmp.eq.f32.partialorder %v2955_v62, inf  ;;  %v2961_v18 = vand.u32 2147483648, %v2955_v62  ;;  %vm2960_vm9 = vcmp.eq.f32.partialorder %v2955_v62, 0.0 }
 0x810   :  { %v3890_v38 = vpop.eup %3889 }
 0x811   :  { %v2957_v60 = vmul.f32 %v3890_v38, %v2955_v62 }
 0x813   :  { %v2959_v51 = vsel %vm2958_vm8, %v2955_v62, %v2957_v60 }
 0x814   :  { %v2962_v15 = vsel %vm2960_vm9, %v2961_v18, %v2959_v51 }
 0x815   :  { %v2963_v39 = vadd.f32 1e-08, %v2962_v15 }
 0x817   :  { %3891 = vrcp.f32 %v2963_v39 }
 0x821   :  { %v3892_v16 = vpop.eup %3891 }
 0x822   :  { %v2965_v40 = vmul.f32 %v3892_v16, %v2949_v59 }
 0x824   :  { %2966 = vst.msk [vmem:[#allocation2] sm:$0x3] %vm2943_vm7, %v2965_v40 }
 0x825   :  { %3904 = shalt.err (!%p3901_p4)
}
 0x826   :  { %s3905_s19 = scalar_lea.hbm %s5162_s9, 32 }
 0x827   :  { %p3906_p5 = scmp.ne.s32.totalorder %s5162_s9, %s3905_s19  ;;  %p3909_p6 = scmp.lt.u32.totalorder %s3905_s19, %s5162_s9 }
 0x829   :  { %p3911_p7 = pnand %p3909_p6, %p3906_p5 }
 0x82b   :  { %3914 = shalt.err (!%p3911_p7)
}
 0x82c   :  { %2976 = dma.vmem_to_hbm [thread:$0]  %s2974_s8, 32, %s5162_s9, [#allocation3]  }
 0x82d   :  { %3915 = dma.done.wait [#allocation3], 32  }
 0x82e   :  { %3916 = vsyncadd [#allocation3], 4294967264 }
 0x82f   :  { %2980 = vsyncpa [#allocation3], 1 }

</bundles_post_ra>
